<compile_context>
chip_gen: v7x
topology: tpu7x:2x2x1
jax: 0.10.0
libtpu: 0.0.40
codegen_flags: <defaults>
</compile_context>

<pallas_src>
import functools

import jax
import jax.numpy as jnp
from jax import lax
from jax.experimental import pallas as pl
from jax.experimental.pallas import tpu as pltpu

_LANE = 128
_VMEM_LIMIT = 32 * 1024 * 1024


def _round_up(x, m):
    return (x + m - 1) // m * m


def _pick_tn(mp):
    """Largest lane-aligned tile (<=1024) dividing the padded M extent."""
    for t in (1024, 512, 256, 128):
        if t <= mp and mp % t == 0:
            return t
    return mp


def _pad_to(a, rows, cols):
    r, c = a.shape
    if r == rows and c == cols:
        return a
    return jnp.pad(a, ((0, rows - r), (0, cols - c)))


def _prep_weight(w, kp):
    """(OC, C, kh, kw) -> zero-padded (OC, Kp) bf16 GEMM operand."""
    oc = w.shape[0]
    return _pad_to(w.reshape(oc, -1), oc, kp).astype(jnp.bfloat16)


# ----------------------------------------------------------------------------
# Kernels
# ----------------------------------------------------------------------------
def _conv_lrelu_kernel(w_ref, p_ref, o_ref, *, slope):
    """y[OC, tn] = LeakyReLU(W @ patches_tile); single K tile, no accumulator."""
    y = jnp.dot(w_ref[...], p_ref[...], preferred_element_type=jnp.float32)
    o_ref[...] = jnp.where(y >= 0, y, slope * y).astype(o_ref.dtype)


def _bn_from_acc(acc, gamma, beta, *, m, eps):
    """BatchNorm (training-mode batch stats) applied to the resident f32 tile.

    Padded M columns of `acc` are exactly zero (zero-padded patches), so the
    sum is over valid columns; the centered pass is masked when Mp > m.
    """
    mp = acc.shape[1]
    inv_m = 1.0 / m
    mean = jnp.sum(acc, axis=1, keepdims=True) * inv_m            # (OC, 1)
    diff = acc - mean
    if mp != m:
        col = lax.broadcasted_iota(jnp.int32, acc.shape, 1)
        diff = jnp.where(col < m, diff, 0.0)
    var = jnp.sum(diff * diff, axis=1, keepdims=True) * inv_m     # biased var
    scale = gamma * lax.rsqrt(var + eps)
    shift = beta - mean * scale
    return acc * scale + shift


def _conv_bn_lrelu_kernel(w_ref, p_ref, g_ref, b_ref, o_ref, *, m, eps, slope):
    """Conv GEMM + fused BatchNorm(batch stats) + LeakyReLU, whole M resident."""
    acc = jnp.dot(w_ref[...], p_ref[...], preferred_element_type=jnp.float32)
    z = _bn_from_acc(acc, g_ref[...], b_ref[...], m=m, eps=eps)
    o_ref[...] = jnp.where(z >= 0, z, slope * z).astype(o_ref.dtype)


def _conv_bn_lrelu_head_kernel(w_ref, p_ref, g_ref, b_ref, w5_ref, sel_ref,
                               o_ref, *, m, eps, slope):
    """Layer 4 (conv+BN+LeakyReLU) with layer 5 (4x4 conv + Sigmoid) fused.

    w5_ref is the layer-5 weight tiled along M (zeros on padded columns);
    sel_ref sums the per-batch column groups; the layer-4 activation never
    leaves VMEM.
    """
    acc = jnp.dot(w_ref[...], p_ref[...], preferred_element_type=jnp.float32)
    z = _bn_from_acc(acc, g_ref[...], b_ref[...], m=m, eps=eps)
    a = jnp.where(z >= 0, z, slope * z)                           # (OC4, Mp) f32
    prod = a * w5_ref[...]                                        # 0 on pad cols
    grouped = jnp.dot(prod, sel_ref[...],
                      preferred_element_type=jnp.float32)         # (OC4, Np)
    logits = jnp.sum(grouped, axis=0, keepdims=True)              # (1, Np)
    sig = 1.0 / (1.0 + jnp.exp(-logits))
    o_ref[...] = jnp.broadcast_to(sig, o_ref.shape).astype(o_ref.dtype)


# ----------------------------------------------------------------------------
# pallas_call wrappers
# ----------------------------------------------------------------------------
def conv_lrelu(w2d, patches):
    oc, kp = w2d.shape
    kp2, mp = patches.shape
    assert kp == kp2
    tn = _pick_tn(mp)
    nm = mp // tn
    return pl.pallas_call(
        functools.partial(_conv_lrelu_kernel, slope=0.2),
        out_shape=jax.ShapeDtypeStruct((oc, mp), jnp.bfloat16),
        grid_spec=pltpu.PrefetchScalarGridSpec(
            num_scalar_prefetch=0,
            grid=(nm,),
            in_specs=[pl.BlockSpec((oc, kp), lambda i: (0, 0)),
                      pl.BlockSpec((kp, tn), lambda i: (0, i))],
            out_specs=pl.BlockSpec((oc, tn), lambda i: (0, i)),
        ),
        compiler_params=pltpu.CompilerParams(
            dimension_semantics=("parallel",),
            vmem_limit_bytes=_VMEM_LIMIT),
    )(w2d, patches)


def conv_bn_lrelu(w2d, patches, gamma, beta, *, m, eps):
    oc, kp = w2d.shape
    kp2, mp = patches.shape
    assert kp == kp2
    return pl.pallas_call(
        functools.partial(_conv_bn_lrelu_kernel, m=m, eps=eps, slope=0.2),
        out_shape=jax.ShapeDtypeStruct((oc, mp), jnp.bfloat16),
        grid_spec=pltpu.PrefetchScalarGridSpec(
            num_scalar_prefetch=0,
            grid=(1,),
            in_specs=[pl.BlockSpec((oc, kp), lambda i: (0, 0)),
                      pl.BlockSpec((kp, mp), lambda i: (0, 0)),
                      pl.BlockSpec((oc, 1), lambda i: (0, 0)),
                      pl.BlockSpec((oc, 1), lambda i: (0, 0))],
            out_specs=pl.BlockSpec((oc, mp), lambda i: (0, 0)),
        ),
        compiler_params=pltpu.CompilerParams(
            dimension_semantics=("arbitrary",),
            vmem_limit_bytes=_VMEM_LIMIT),
    )(w2d, patches, gamma.reshape(oc, 1).astype(jnp.float32),
      beta.reshape(oc, 1).astype(jnp.float32))


def conv_bn_lrelu_sigmoid_head(w2d, patches, gamma, beta, w5_tiled, sel,
                               *, m, eps):
    oc, kp = w2d.shape
    kp2, mp = patches.shape
    assert kp == kp2
    np_ = sel.shape[1]
    return pl.pallas_call(
        functools.partial(_conv_bn_lrelu_head_kernel, m=m, eps=eps, slope=0.2),
        out_shape=jax.ShapeDtypeStruct((8, np_), jnp.float32),
        grid_spec=pltpu.PrefetchScalarGridSpec(
            num_scalar_prefetch=0,
            grid=(1,),
            in_specs=[pl.BlockSpec((oc, kp), lambda i: (0, 0)),
                      pl.BlockSpec((kp, mp), lambda i: (0, 0)),
                      pl.BlockSpec((oc, 1), lambda i: (0, 0)),
                      pl.BlockSpec((oc, 1), lambda i: (0, 0)),
                      pl.BlockSpec((oc, mp), lambda i: (0, 0)),
                      pl.BlockSpec((mp, np_), lambda i: (0, 0))],
            out_specs=pl.BlockSpec((8, np_), lambda i: (0, 0)),
        ),
        compiler_params=pltpu.CompilerParams(
            dimension_semantics=("arbitrary",),
            vmem_limit_bytes=_VMEM_LIMIT),
    )(w2d, patches, gamma.reshape(oc, 1).astype(jnp.float32),
      beta.reshape(oc, 1).astype(jnp.float32),
      w5_tiled.astype(jnp.float32), sel.astype(jnp.float32))


# ----------------------------------------------------------------------------
# Glue: channel-major im2col (plain JAX, bf16, emitted already padded upstream)
# ----------------------------------------------------------------------------
# TODO(synk): fuse the im2col window gather into the GEMM kernels (strided
# pl.ds reads on a VMEM-resident input) to remove the k*k patch expansion.
def im2col_cm(x, k, s, p):
    """x: (C, N, H, W) channel-major bf16 activations.

    Returns patches^T of shape (C*k*k, N*OH*OW); K ordered (c, kh, kw) and
    M ordered (n, oh, ow) so no large transposes are needed.
    """
    C, N, H, W = x.shape
    if p > 0:
        x = jnp.pad(x, ((0, 0), (0, 0), (p, p), (p, p)))
    Hp, Wp = H + 2 * p, W + 2 * p
    OH = (Hp - k) // s + 1
    OW = (Wp - k) // s + 1
    M = N * OH * OW
    cols = []
    for i in range(k):
        for j in range(k):
            cols.append(x[:, :, i:i + s * OH:s, j:j + s * OW:s].reshape(C, 1, M))
    pt = jnp.concatenate(cols, axis=1)            # (C, k*k, M)
    return pt.reshape(C * k * k, M), OH, OW


# ----------------------------------------------------------------------------
# Discriminator forward
# ----------------------------------------------------------------------------
def discriminator_forward(x_nchw, params):
    n = x_nchw.shape[0]
    eps = 1e-5
    # Channel-major (C, N, H, W) activations; bf16 GEMM operand stream.
    x = jnp.transpose(x_nchw, (1, 0, 2, 3)).astype(jnp.bfloat16)

    # --- layer 1: Conv(nc, ndf, 4, 2, 1) + LeakyReLU(0.2) fused in the GEMM ---
    pt, oh, ow = im2col_cm(x, 4, 2, 1)
    kk, mm = pt.shape
    kp, mp = _round_up(kk, _LANE), _round_up(mm, _LANE)
    m = n * oh * ow
    y = conv_lrelu(_prep_weight(params["w1"], kp), _pad_to(pt, kp, mp))
    x = y[:, :m].reshape(-1, n, oh, ow)

    # --- layers 2,3: Conv + BatchNorm(batch stats) + LeakyReLU, single kernel ---
    for li in (2, 3):
        pt, oh, ow = im2col_cm(x, 4, 2, 1)
        kk, mm = pt.shape
        kp, mp = _round_up(kk, _LANE), _round_up(mm, _LANE)
        m = n * oh * ow
        y = conv_bn_lrelu(_prep_weight(params[f"w{li}"], kp),
                          _pad_to(pt, kp, mp),
                          params[f"g{li}"], params[f"b{li}"], m=m, eps=eps)
        x = y[:, :m].reshape(-1, n, oh, ow)

    # --- layer 4 (Conv+BN+LeakyReLU) + layer 5 (4x4 Conv + Sigmoid): one kernel ---
    pt, oh, ow = im2col_cm(x, 4, 2, 1)
    kk, mm = pt.shape
    kp, mp = _round_up(kk, _LANE), _round_up(mm, _LANE)
    m = n * oh * ow
    assert oh == 4 and ow == 4, "layer-5 4x4/s1/p0 conv assumes a 4x4 layer-4 map"
    hw = oh * ow
    oc4 = params["w4"].shape[0]
    np_ = _round_up(n, _LANE)

    # Layer-5 weight tiled along the M (= n, oh, ow) axis; zero on padded cols.
    w5_2d = params["w5"][0].reshape(oc4, hw).astype(jnp.float32)     # (OC4, 16)
    w5_tiled = _pad_to(jnp.tile(w5_2d, (1, n)), oc4, mp)
    # Per-batch column-group summation matrix (lane-group reduce via one MXU op).
    j = jnp.arange(mp)
    bidx = jnp.arange(np_)
    sel = (((j[:, None] // hw) == bidx[None, :]) & (j[:, None] < m))

    out_pad = conv_bn_lrelu_sigmoid_head(
        _prep_weight(params["w4"], kp), _pad_to(pt, kp, mp),
        params["g4"], params["b4"], w5_tiled, sel, m=m, eps=eps)
    return out_pad[0, :n].reshape(n, 1, 1, 1)                        # (N, 1, 1, 1)


# ----------------------------------------------------------------------------
# Pure-JAX reference (for correctness check)
# ----------------------------------------------------------------------------
def _reference_forward(x_nchw, params):
    eps = 1e-5

    def conv(x, w, s, p):
        return jax.lax.conv_general_dilated(
            x, w, window_strides=(s, s), padding=[(p, p), (p, p)],
            dimension_numbers=("NCHW", "OIHW", "NCHW"))

    def lrelu(x):
        return jnp.where(x >= 0, x, 0.2 * x)

    x = lrelu(conv(x_nchw, params["w1"], 2, 1))
    for i in (2, 3, 4):
        x = conv(x, params[f"w{i}"], 2, 1)
        mean = x.mean(axis=(0, 2, 3), keepdims=True)
        var = x.var(axis=(0, 2, 3), keepdims=True)
        g = params[f"g{i}"].reshape(1, -1, 1, 1)
        b = params[f"b{i}"].reshape(1, -1, 1, 1)
        x = lrelu((x - mean) * jax.lax.rsqrt(var + eps) * g + b)
    x = conv(x, params["w5"], 1, 0)
    return jax.nn.sigmoid(x)


# ----------------------------------------------------------------------------
# Deterministic parameter init (mirrors weights_init: conv ~ N(0, 0.02),
# BN weight ~ N(1, 0.02), BN bias = 0)
# ----------------------------------------------------------------------------
def init_params(key, nc=3, ndf=8):
    ks = jax.random.split(key, 8)
    return {
        "w1": 0.02 * jax.random.normal(ks[0], (ndf, nc, 4, 4), jnp.float32),
        "w2": 0.02 * jax.random.normal(ks[1], (ndf * 2, ndf, 4, 4), jnp.float32),
        "w3": 0.02 * jax.random.normal(ks[2], (ndf * 4, ndf * 2, 4, 4), jnp.float32),
        "w4": 0.02 * jax.random.normal(ks[3], (ndf * 8, ndf * 4, 4, 4), jnp.float32),
        "w5": 0.02 * jax.random.normal(ks[4], (1, ndf * 8, 4, 4), jnp.float32),
        "g2": 1.0 + 0.02 * jax.random.normal(ks[5], (ndf * 2,), jnp.float32),
        "b2": jnp.zeros((ndf * 2,), jnp.float32),
        "g3": 1.0 + 0.02 * jax.random.normal(ks[6], (ndf * 4,), jnp.float32),
        "b3": jnp.zeros((ndf * 4,), jnp.float32),
        "g4": 1.0 + 0.02 * jax.random.normal(ks[7], (ndf * 8,), jnp.float32),
        "b4": jnp.zeros((ndf * 8,), jnp.float32),
    }


if __name__ == "__main__":
    key = jax.random.PRNGKey(0)
    k_params, k_x = jax.random.split(key)

    # 64x64 input is required by the architecture (4 stride-2 convs + 4x4 conv)
    nc, ndf, batch, spatial = 3, 8, 2, 64
    params = init_params(k_params, nc=nc, ndf=ndf)
    x = jax.random.normal(k_x, (batch, nc, spatial, spatial), jnp.float32)

    fwd = jax.jit(functools.partial(discriminator_forward, params=params))
    out = fwd(x)
    jax.block_until_ready(out)

    assert out.shape == (batch, 1, 1, 1)
    assert bool(jnp.all((out >= -1e-3) & (out <= 1.0 + 1e-3)))  # sigmoid range

    ref = _reference_forward(x, params)
    err = float(jnp.max(jnp.abs(out.astype(jnp.float32) - ref)))
    assert err < 5e-2, f"max abs error vs reference: {err}"
    print("KERNEL_OK")
</pallas_src>

<mosaic_0001>
module attributes {stable_mosaic.version = 11 : i64} {
  func.func @_conv_lrelu_kernel(%arg0: i32, %arg1: memref<8x128xbf16, #tpu.memory_space<vmem>>, %arg2: memref<128x1024xbf16, #tpu.memory_space<vmem>>, %arg3: memref<8x1024xbf16, #tpu.memory_space<vmem>>) attributes {dimension_semantics = [#tpu.dimension_semantics<parallel>], iteration_bounds = array<i64: 2>, scalar_prefetch = 0 : i64, scratch_operands = 0 : i64, tpu.core_type = #tpu.core_type<tc>, window_params = [{pipeline_mode = #tpu.pipeline_mode<synchronous>, transform_indices = @transform_0, window_bounds = array<i64: 8, 128>}, {transform_indices = @transform_1, window_bounds = array<i64: 128, 1024>}, {transform_indices = @transform_2, window_bounds = array<i64: 8, 1024>}]} {
    %c0 = arith.constant 0 : index
    %c0_0 = arith.constant 0 : index
    %0 = vector.load %arg1[%c0, %c0_0] : memref<8x128xbf16, #tpu.memory_space<vmem>>, vector<8x128xbf16>
    %c0_1 = arith.constant 0 : index
    %c0_2 = arith.constant 0 : index
    %1 = vector.load %arg2[%c0_1, %c0_2] : memref<128x1024xbf16, #tpu.memory_space<vmem>>, vector<128x1024xbf16>
    %cst = arith.constant dense<0.000000e+00> : vector<8x1024xf32>
    %2 = tpu.matmul %0, %1, %cst {dimension_numbers = #tpu.dot_dimension_numbers<[1], [0], [0], [1], [0, 0, 1, 1], [], []>} : vector<8x128xbf16>, vector<128x1024xbf16>, vector<8x1024xf32> -> vector<8x1024xf32>
    %cst_3 = arith.constant 0.000000e+00 : f32
    %3 = vector.broadcast %cst_3 : f32 to vector<8x1024xf32>
    %4 = arith.cmpf oge, %2, %3 : vector<8x1024xf32>
    %cst_4 = arith.constant 2.000000e-01 : f32
    %5 = vector.broadcast %cst_4 : f32 to vector<8x1024xf32>
    %6 = arith.mulf %5, %2 : vector<8x1024xf32>
    %7 = arith.select %4, %2, %6 : vector<8x1024xi1>, vector<8x1024xf32>
    %8 = arith.truncf %7 : vector<8x1024xf32> to vector<8x1024xbf16>
    %c0_5 = arith.constant 0 : index
    %c0_6 = arith.constant 0 : index
    %9 = vector.load %arg3[%c0_5, %c0_6] : memref<8x1024xbf16, #tpu.memory_space<vmem>>, vector<8x1024xbf16>
    tpu.vector_store %arg3[%c0_5, %c0_6], %8 {strides = array<i32>} : memref<8x1024xbf16, #tpu.memory_space<vmem>>, vector<8x1024xbf16>,
    return
  }
  func.func @transform_0(%arg0: i32) -> (i32, i32) {
    %c0_i32 = arith.constant 0 : i32
    %c0_i32_0 = arith.constant 0 : i32
    %c0_i32_1 = arith.constant 0 : i32
    return %c0_i32, %c0_i32_0 : i32, i32
  }
  func.func @transform_1(%arg0: i32) -> (i32, i32) {
    %c0_i32 = arith.constant 0 : i32
    %c0_i32_0 = arith.constant 0 : i32
    return %c0_i32, %arg0 : i32, i32
  }
  func.func @transform_2(%arg0: i32) -> (i32, i32) {
    %c0_i32 = arith.constant 0 : i32
    %c0_i32_0 = arith.constant 0 : i32
    return %c0_i32, %arg0 : i32, i32
  }
}

module attributes {stable_mosaic.version = 11 : i64} {
  func.func @_conv_bn_lrelu_kernel(%arg0: i32, %arg1: memref<16x128xbf16, #tpu.memory_space<vmem>>, %arg2: memref<128x512xbf16, #tpu.memory_space<vmem>>, %arg3: memref<16x1xf32, #tpu.memory_space<vmem>>, %arg4: memref<16x1xf32, #tpu.memory_space<vmem>>, %arg5: memref<16x512xbf16, #tpu.memory_space<vmem>>) attributes {dimension_semantics = [#tpu.dimension_semantics<arbitrary>], iteration_bounds = array<i64: 1>, scalar_prefetch = 0 : i64, scratch_operands = 0 : i64, tpu.core_type = #tpu.core_type<tc>, window_params = [{pipeline_mode = #tpu.pipeline_mode<synchronous>, transform_indices = @transform_0, window_bounds = array<i64: 16, 128>}, {pipeline_mode = #tpu.pipeline_mode<synchronous>, transform_indices = @transform_1, window_bounds = array<i64: 128, 512>}, {pipeline_mode = #tpu.pipeline_mode<synchronous>, transform_indices = @transform_2, window_bounds = array<i64: 16, 1>}, {pipeline_mode = #tpu.pipeline_mode<synchronous>, transform_indices = @transform_3, window_bounds = array<i64: 16, 1>}, {pipeline_mode = #tpu.pipeline_mode<synchronous>, transform_indices = @transform_4, window_bounds = array<i64: 16, 512>}]} {
    %c0 = arith.constant 0 : index
    %c0_0 = arith.constant 0 : index
    %0 = vector.load %arg1[%c0, %c0_0] : memref<16x128xbf16, #tpu.memory_space<vmem>>, vector<16x128xbf16>
    %c0_1 = arith.constant 0 : index
    %c0_2 = arith.constant 0 : index
    %1 = vector.load %arg2[%c0_1, %c0_2] : memref<128x512xbf16, #tpu.memory_space<vmem>>, vector<128x512xbf16>
    %cst = arith.constant dense<0.000000e+00> : vector<16x512xf32>
    %2 = tpu.matmul %0, %1, %cst {dimension_numbers = #tpu.dot_dimension_numbers<[1], [0], [0], [1], [0, 0, 1, 1], [], []>} : vector<16x128xbf16>, vector<128x512xbf16>, vector<16x512xf32> -> vector<16x512xf32>
    %c0_3 = arith.constant 0 : index
    %c0_4 = arith.constant 0 : index
    %3 = vector.load %arg3[%c0_3, %c0_4] : memref<16x1xf32, #tpu.memory_space<vmem>>, vector<16x1xf32>
    %c0_5 = arith.constant 0 : index
    %c0_6 = arith.constant 0 : index
    %4 = vector.load %arg4[%c0_5, %c0_6] : memref<16x1xf32, #tpu.memory_space<vmem>>, vector<16x1xf32>
    %cst_7 = arith.constant dense<0.000000e+00> : vector<16xf32>
    %5 = vector.multi_reduction <add>, %2, %cst_7 [1] : vector<16x512xf32> to vector<16xf32>
    %6 = vector.shape_cast %5 : vector<16xf32> to vector<16x1xf32>
    %cst_8 = arith.constant 0.001953125 : f32
    %7 = vector.broadcast %cst_8 : f32 to vector<16x1xf32>
    %8 = arith.mulf %6, %7 : vector<16x1xf32>
    %9 = vector.broadcast %8 : vector<16x1xf32> to vector<16x512xf32>
    %10 = arith.subf %2, %9 : vector<16x512xf32>
    %11 = arith.mulf %10, %10 : vector<16x512xf32>
    %cst_9 = arith.constant dense<0.000000e+00> : vector<16xf32>
    %12 = vector.multi_reduction <add>, %11, %cst_9 [1] : vector<16x512xf32> to vector<16xf32>
    %13 = vector.shape_cast %12 : vector<16xf32> to vector<16x1xf32>
    %cst_10 = arith.constant 0.001953125 : f32
    %14 = vector.broadcast %cst_10 : f32 to vector<16x1xf32>
    %15 = arith.mulf %13, %14 : vector<16x1xf32>
    %cst_11 = arith.constant 9.99999974E-6 : f32
    %16 = vector.broadcast %cst_11 : f32 to vector<16x1xf32>
    %17 = arith.addf %15, %16 : vector<16x1xf32>
    %18 = math.rsqrt %17 : vector<16x1xf32>
    %19 = arith.mulf %3, %18 : vector<16x1xf32>
    %20 = arith.mulf %8, %19 : vector<16x1xf32>
    %21 = arith.subf %4, %20 : vector<16x1xf32>
    %22 = vector.broadcast %19 : vector<16x1xf32> to vector<16x512xf32>
    %23 = arith.mulf %2, %22 : vector<16x512xf32>
    %24 = vector.broadcast %21 : vector<16x1xf32> to vector<16x512xf32>
    %25 = arith.addf %23, %24 : vector<16x512xf32>
    %cst_12 = arith.constant 0.000000e+00 : f32
    %26 = vector.broadcast %cst_12 : f32 to vector<16x512xf32>
    %27 = arith.cmpf oge, %25, %26 : vector<16x512xf32>
    %cst_13 = arith.constant 2.000000e-01 : f32
    %28 = vector.broadcast %cst_13 : f32 to vector<16x512xf32>
    %29 = arith.mulf %28, %25 : vector<16x512xf32>
    %30 = arith.select %27, %25, %29 : vector<16x512xi1>, vector<16x512xf32>
    %31 = arith.truncf %30 : vector<16x512xf32> to vector<16x512xbf16>
    %c0_14 = arith.constant 0 : index
    %c0_15 = arith.constant 0 : index
    %32 = vector.load %arg5[%c0_14, %c0_15] : memref<16x512xbf16, #tpu.memory_space<vmem>>, vector<16x512xbf16>
    tpu.vector_store %arg5[%c0_14, %c0_15], %31 {strides = array<i32>} : memref<16x512xbf16, #tpu.memory_space<vmem>>, vector<16x512xbf16>,
    return
  }
  func.func @transform_0(%arg0: i32) -> (i32, i32) {
    %c0_i32 = arith.constant 0 : i32
    %c0_i32_0 = arith.constant 0 : i32
    %c0_i32_1 = arith.constant 0 : i32
    return %c0_i32, %c0_i32_0 : i32, i32
  }
  func.func @transform_1(%arg0: i32) -> (i32, i32) {
    %c0_i32 = arith.constant 0 : i32
    %c0_i32_0 = arith.constant 0 : i32
    %c0_i32_1 = arith.constant 0 : i32
    return %c0_i32, %c0_i32_0 : i32, i32
  }
  func.func @transform_2(%arg0: i32) -> (i32, i32) {
    %c0_i32 = arith.constant 0 : i32
    %c0_i32_0 = arith.constant 0 : i32
    %c0_i32_1 = arith.constant 0 : i32
    return %c0_i32, %c0_i32_0 : i32, i32
  }
  func.func @transform_3(%arg0: i32) -> (i32, i32) {
    %c0_i32 = arith.constant 0 : i32
    %c0_i32_0 = arith.constant 0 : i32
    %c0_i32_1 = arith.constant 0 : i32
    return %c0_i32, %c0_i32_0 : i32, i32
  }
  func.func @transform_4(%arg0: i32) -> (i32, i32) {
    %c0_i32 = arith.constant 0 : i32
    %c0_i32_0 = arith.constant 0 : i32
    %c0_i32_1 = arith.constant 0 : i32
    return %c0_i32, %c0_i32_0 : i32, i32
  }
}

module attributes {stable_mosaic.version = 11 : i64} {
  func.func @_conv_bn_lrelu_kernel(%arg0: i32, %arg1: memref<32x256xbf16, #tpu.memory_space<vmem>>, %arg2: memref<256x128xbf16, #tpu.memory_space<vmem>>, %arg3: memref<32x1xf32, #tpu.memory_space<vmem>>, %arg4: memref<32x1xf32, #tpu.memory_space<vmem>>, %arg5: memref<32x128xbf16, #tpu.memory_space<vmem>>) attributes {dimension_semantics = [#tpu.dimension_semantics<arbitrary>], iteration_bounds = array<i64: 1>, scalar_prefetch = 0 : i64, scratch_operands = 0 : i64, tpu.core_type = #tpu.core_type<tc>, window_params = [{pipeline_mode = #tpu.pipeline_mode<synchronous>, transform_indices = @transform_0, window_bounds = array<i64: 32, 256>}, {pipeline_mode = #tpu.pipeline_mode<synchronous>, transform_indices = @transform_1, window_bounds = array<i64: 256, 128>}, {pipeline_mode = #tpu.pipeline_mode<synchronous>, transform_indices = @transform_2, window_bounds = array<i64: 32, 1>}, {pipeline_mode = #tpu.pipeline_mode<synchronous>, transform_indices = @transform_3, window_bounds = array<i64: 32, 1>}, {pipeline_mode = #tpu.pipeline_mode<synchronous>, transform_indices = @transform_4, window_bounds = array<i64: 32, 128>}]} {
    %c0 = arith.constant 0 : index
    %c0_0 = arith.constant 0 : index
    %0 = vector.load %arg1[%c0, %c0_0] : memref<32x256xbf16, #tpu.memory_space<vmem>>, vector<32x256xbf16>
    %c0_1 = arith.constant 0 : index
    %c0_2 = arith.constant 0 : index
    %1 = vector.load %arg2[%c0_1, %c0_2] : memref<256x128xbf16, #tpu.memory_space<vmem>>, vector<256x128xbf16>
    %cst = arith.constant dense<0.000000e+00> : vector<32x128xf32>
    %2 = tpu.matmul %0, %1, %cst {dimension_numbers = #tpu.dot_dimension_numbers<[1], [0], [0], [1], [0, 0, 1, 1], [], []>} : vector<32x256xbf16>, vector<256x128xbf16>, vector<32x128xf32> -> vector<32x128xf32>
    %c0_3 = arith.constant 0 : index
    %c0_4 = arith.constant 0 : index
    %3 = vector.load %arg3[%c0_3, %c0_4] : memref<32x1xf32, #tpu.memory_space<vmem>>, vector<32x1xf32>
    %c0_5 = arith.constant 0 : index
    %c0_6 = arith.constant 0 : index
    %4 = vector.load %arg4[%c0_5, %c0_6] : memref<32x1xf32, #tpu.memory_space<vmem>>, vector<32x1xf32>
    %cst_7 = arith.constant dense<0.000000e+00> : vector<32xf32>
    %5 = vector.multi_reduction <add>, %2, %cst_7 [1] : vector<32x128xf32> to vector<32xf32>
    %6 = vector.shape_cast %5 : vector<32xf32> to vector<32x1xf32>
    %cst_8 = arith.constant 7.812500e-03 : f32
    %7 = vector.broadcast %cst_8 : f32 to vector<32x1xf32>
    %8 = arith.mulf %6, %7 : vector<32x1xf32>
    %9 = vector.broadcast %8 : vector<32x1xf32> to vector<32x128xf32>
    %10 = arith.subf %2, %9 : vector<32x128xf32>
    %11 = arith.mulf %10, %10 : vector<32x128xf32>
    %cst_9 = arith.constant dense<0.000000e+00> : vector<32xf32>
    %12 = vector.multi_reduction <add>, %11, %cst_9 [1] : vector<32x128xf32> to vector<32xf32>
    %13 = vector.shape_cast %12 : vector<32xf32> to vector<32x1xf32>
    %cst_10 = arith.constant 7.812500e-03 : f32
    %14 = vector.broadcast %cst_10 : f32 to vector<32x1xf32>
    %15 = arith.mulf %13, %14 : vector<32x1xf32>
    %cst_11 = arith.constant 9.99999974E-6 : f32
    %16 = vector.broadcast %cst_11 : f32 to vector<32x1xf32>
    %17 = arith.addf %15, %16 : vector<32x1xf32>
    %18 = math.rsqrt %17 : vector<32x1xf32>
    %19 = arith.mulf %3, %18 : vector<32x1xf32>
    %20 = arith.mulf %8, %19 : vector<32x1xf32>
    %21 = arith.subf %4, %20 : vector<32x1xf32>
    %22 = vector.broadcast %19 : vector<32x1xf32> to vector<32x128xf32>
    %23 = arith.mulf %2, %22 : vector<32x128xf32>
    %24 = vector.broadcast %21 : vector<32x1xf32> to vector<32x128xf32>
    %25 = arith.addf %23, %24 : vector<32x128xf32>
    %cst_12 = arith.constant 0.000000e+00 : f32
    %26 = vector.broadcast %cst_12 : f32 to vector<32x128xf32>
    %27 = arith.cmpf oge, %25, %26 : vector<32x128xf32>
    %cst_13 = arith.constant 2.000000e-01 : f32
    %28 = vector.broadcast %cst_13 : f32 to vector<32x128xf32>
    %29 = arith.mulf %28, %25 : vector<32x128xf32>
    %30 = arith.select %27, %25, %29 : vector<32x128xi1>, vector<32x128xf32>
    %31 = arith.truncf %30 : vector<32x128xf32> to vector<32x128xbf16>
    %c0_14 = arith.constant 0 : index
    %c0_15 = arith.constant 0 : index
    %32 = vector.load %arg5[%c0_14, %c0_15] : memref<32x128xbf16, #tpu.memory_space<vmem>>, vector<32x128xbf16>
    tpu.vector_store %arg5[%c0_14, %c0_15], %31 {strides = array<i32>} : memref<32x128xbf16, #tpu.memory_space<vmem>>, vector<32x128xbf16>,
    return
  }
  func.func @transform_0(%arg0: i32) -> (i32, i32) {
    %c0_i32 = arith.constant 0 : i32
    %c0_i32_0 = arith.constant 0 : i32
    %c0_i32_1 = arith.constant 0 : i32
    return %c0_i32, %c0_i32_0 : i32, i32
  }
  func.func @transform_1(%arg0: i32) -> (i32, i32) {
    %c0_i32 = arith.constant 0 : i32
    %c0_i32_0 = arith.constant 0 : i32
    %c0_i32_1 = arith.constant 0 : i32
    return %c0_i32, %c0_i32_0 : i32, i32
  }
  func.func @transform_2(%arg0: i32) -> (i32, i32) {
    %c0_i32 = arith.constant 0 : i32
    %c0_i32_0 = arith.constant 0 : i32
    %c0_i32_1 = arith.constant 0 : i32
    return %c0_i32, %c0_i32_0 : i32, i32
  }
  func.func @transform_3(%arg0: i32) -> (i32, i32) {
    %c0_i32 = arith.constant 0 : i32
    %c0_i32_0 = arith.constant 0 : i32
    %c0_i32_1 = arith.constant 0 : i32
    return %c0_i32, %c0_i32_0 : i32, i32
  }
  func.func @transform_4(%arg0: i32) -> (i32, i32) {
    %c0_i32 = arith.constant 0 : i32
    %c0_i32_0 = arith.constant 0 : i32
    %c0_i32_1 = arith.constant 0 : i32
    return %c0_i32, %c0_i32_0 : i32, i32
  }
}

module attributes {stable_mosaic.version = 11 : i64} {
  func.func @_conv_bn_lrelu_head_kernel(%arg0: i32, %arg1: memref<64x512xbf16, #tpu.memory_space<vmem>>, %arg2: memref<512x128xbf16, #tpu.memory_space<vmem>>, %arg3: memref<64x1xf32, #tpu.memory_space<vmem>>, %arg4: memref<64x1xf32, #tpu.memory_space<vmem>>, %arg5: memref<64x128xf32, #tpu.memory_space<vmem>>, %arg6: memref<128x128xf32, #tpu.memory_space<vmem>>, %arg7: memref<8x128xf32, #tpu.memory_space<vmem>>) attributes {dimension_semantics = [#tpu.dimension_semantics<arbitrary>], iteration_bounds = array<i64: 1>, scalar_prefetch = 0 : i64, scratch_operands = 0 : i64, tpu.core_type = #tpu.core_type<tc>, window_params = [{pipeline_mode = #tpu.pipeline_mode<synchronous>, transform_indices = @transform_0, window_bounds = array<i64: 64, 512>}, {pipeline_mode = #tpu.pipeline_mode<synchronous>, transform_indices = @transform_1, window_bounds = array<i64: 512, 128>}, {pipeline_mode = #tpu.pipeline_mode<synchronous>, transform_indices = @transform_2, window_bounds = array<i64: 64, 1>}, {pipeline_mode = #tpu.pipeline_mode<synchronous>, transform_indices = @transform_3, window_bounds = array<i64: 64, 1>}, {pipeline_mode = #tpu.pipeline_mode<synchronous>, transform_indices = @transform_4, window_bounds = array<i64: 64, 128>}, {pipeline_mode = #tpu.pipeline_mode<synchronous>, transform_indices = @transform_5, window_bounds = array<i64: 128, 128>}, {pipeline_mode = #tpu.pipeline_mode<synchronous>, transform_indices = @transform_6, window_bounds = array<i64: 8, 128>}]} {
    %c0 = arith.constant 0 : index
    %c0_0 = arith.constant 0 : index
    %0 = vector.load %arg1[%c0, %c0_0] : memref<64x512xbf16, #tpu.memory_space<vmem>>, vector<64x512xbf16>
    %c0_1 = arith.constant 0 : index
    %c0_2 = arith.constant 0 : index
    %1 = vector.load %arg2[%c0_1, %c0_2] : memref<512x128xbf16, #tpu.memory_space<vmem>>, vector<512x128xbf16>
    %cst = arith.constant dense<0.000000e+00> : vector<64x128xf32>
    %2 = tpu.matmul %0, %1, %cst {dimension_numbers = #tpu.dot_dimension_numbers<[1], [0], [0], [1], [0, 0, 1, 1], [], []>} : vector<64x512xbf16>, vector<512x128xbf16>, vector<64x128xf32> -> vector<64x128xf32>
    %c0_3 = arith.constant 0 : index
    %c0_4 = arith.constant 0 : index
    %3 = vector.load %arg3[%c0_3, %c0_4] : memref<64x1xf32, #tpu.memory_space<vmem>>, vector<64x1xf32>
    %c0_5 = arith.constant 0 : index
    %c0_6 = arith.constant 0 : index
    %4 = vector.load %arg4[%c0_5, %c0_6] : memref<64x1xf32, #tpu.memory_space<vmem>>, vector<64x1xf32>
    %cst_7 = arith.constant dense<0.000000e+00> : vector<64xf32>
    %5 = vector.multi_reduction <add>, %2, %cst_7 [1] : vector<64x128xf32> to vector<64xf32>
    %6 = vector.shape_cast %5 : vector<64xf32> to vector<64x1xf32>
    %cst_8 = arith.constant 3.125000e-02 : f32
    %7 = vector.broadcast %cst_8 : f32 to vector<64x1xf32>
    %8 = arith.mulf %6, %7 : vector<64x1xf32>
    %9 = vector.broadcast %8 : vector<64x1xf32> to vector<64x128xf32>
    %10 = arith.subf %2, %9 : vector<64x128xf32>
    %11 = tpu.iota {dimensions = array<i32: 1>} : vector<64x128xi32>
    %c32_i32 = arith.constant 32 : i32
    %12 = vector.broadcast %c32_i32 : i32 to vector<64x128xi32>
    %13 = arith.cmpi slt, %11, %12 : vector<64x128xi32>
    %cst_9 = arith.constant 0.000000e+00 : f32
    %14 = vector.broadcast %cst_9 : f32 to vector<64x128xf32>
    %15 = arith.select %13, %10, %14 : vector<64x128xi1>, vector<64x128xf32>
    %16 = arith.mulf %15, %15 : vector<64x128xf32>
    %cst_10 = arith.constant dense<0.000000e+00> : vector<64xf32>
    %17 = vector.multi_reduction <add>, %16, %cst_10 [1] : vector<64x128xf32> to vector<64xf32>
    %18 = vector.shape_cast %17 : vector<64xf32> to vector<64x1xf32>
    %cst_11 = arith.constant 3.125000e-02 : f32
    %19 = vector.broadcast %cst_11 : f32 to vector<64x1xf32>
    %20 = arith.mulf %18, %19 : vector<64x1xf32>
    %cst_12 = arith.constant 9.99999974E-6 : f32
    %21 = vector.broadcast %cst_12 : f32 to vector<64x1xf32>
    %22 = arith.addf %20, %21 : vector<64x1xf32>
    %23 = math.rsqrt %22 : vector<64x1xf32>
    %24 = arith.mulf %3, %23 : vector<64x1xf32>
    %25 = arith.mulf %8, %24 : vector<64x1xf32>
    %26 = arith.subf %4, %25 : vector<64x1xf32>
    %27 = vector.broadcast %24 : vector<64x1xf32> to vector<64x128xf32>
    %28 = arith.mulf %2, %27 : vector<64x128xf32>
    %29 = vector.broadcast %26 : vector<64x1xf32> to vector<64x128xf32>
    %30 = arith.addf %28, %29 : vector<64x128xf32>
    %cst_13 = arith.constant 0.000000e+00 : f32
    %31 = vector.broadcast %cst_13 : f32 to vector<64x128xf32>
    %32 = arith.cmpf oge, %30, %31 : vector<64x128xf32>
    %cst_14 = arith.constant 2.000000e-01 : f32
    %33 = vector.broadcast %cst_14 : f32 to vector<64x128xf32>
    %34 = arith.mulf %33, %30 : vector<64x128xf32>
    %35 = arith.select %32, %30, %34 : vector<64x128xi1>, vector<64x128xf32>
    %c0_15 = arith.constant 0 : index
    %c0_16 = arith.constant 0 : index
    %36 = vector.load %arg5[%c0_15, %c0_16] : memref<64x128xf32, #tpu.memory_space<vmem>>, vector<64x128xf32>
    %37 = arith.mulf %35, %36 : vector<64x128xf32>
    %c0_17 = arith.constant 0 : index
    %c0_18 = arith.constant 0 : index
    %38 = vector.load %arg6[%c0_17, %c0_18] : memref<128x128xf32, #tpu.memory_space<vmem>>, vector<128x128xf32>
    %cst_19 = arith.constant dense<0.000000e+00> : vector<64x128xf32>
    %39 = tpu.matmul %37, %38, %cst_19 {dimension_numbers = #tpu.dot_dimension_numbers<[1], [0], [0], [1], [0, 0, 1, 1], [], []>} : vector<64x128xf32>, vector<128x128xf32>, vector<64x128xf32> -> vector<64x128xf32>
    %cst_20 = arith.constant dense<0.000000e+00> : vector<128xf32>
    %40 = vector.multi_reduction <add>, %39, %cst_20 [0] : vector<64x128xf32> to vector<128xf32>
    %41 = vector.shape_cast %40 : vector<128xf32> to vector<1x128xf32>
    %cst_21 = arith.constant 0.000000e+00 : f32
    %42 = vector.broadcast %cst_21 : f32 to vector<1x128xf32>
    %43 = arith.subf %42, %41 : vector<1x128xf32>
    %44 = math.exp %43 : vector<1x128xf32>
    %cst_22 = arith.constant 1.000000e+00 : f32
    %45 = vector.broadcast %cst_22 : f32 to vector<1x128xf32>
    %46 = arith.addf %45, %44 : vector<1x128xf32>
    %cst_23 = arith.constant 1.000000e+00 : f32
    %47 = vector.broadcast %cst_23 : f32 to vector<1x128xf32>
    %48 = arith.divf %47, %46 : vector<1x128xf32>
    %49 = vector.shape_cast %48 : vector<1x128xf32> to vector<1x128xf32>
    %50 = vector.broadcast %49 : vector<1x128xf32> to vector<8x128xf32>
    %c0_24 = arith.constant 0 : index
    %c0_25 = arith.constant 0 : index
    %51 = vector.load %arg7[%c0_24, %c0_25] : memref<8x128xf32, #tpu.memory_space<vmem>>, vector<8x128xf32>
    tpu.vector_store %arg7[%c0_24, %c0_25], %50 {strides = array<i32>} : memref<8x128xf32, #tpu.memory_space<vmem>>, vector<8x128xf32>,
    return
  }
  func.func @transform_0(%arg0: i32) -> (i32, i32) {
    %c0_i32 = arith.constant 0 : i32
    %c0_i32_0 = arith.constant 0 : i32
    %c0_i32_1 = arith.constant 0 : i32
    return %c0_i32, %c0_i32_0 : i32, i32
  }
  func.func @transform_1(%arg0: i32) -> (i32, i32) {
    %c0_i32 = arith.constant 0 : i32
    %c0_i32_0 = arith.constant 0 : i32
    %c0_i32_1 = arith.constant 0 : i32
    return %c0_i32, %c0_i32_0 : i32, i32
  }
  func.func @transform_2(%arg0: i32) -> (i32, i32) {
    %c0_i32 = arith.constant 0 : i32
    %c0_i32_0 = arith.constant 0 : i32
    %c0_i32_1 = arith.constant 0 : i32
    return %c0_i32, %c0_i32_0 : i32, i32
  }
  func.func @transform_3(%arg0: i32) -> (i32, i32) {
    %c0_i32 = arith.constant 0 : i32
    %c0_i32_0 = arith.constant 0 : i32
    %c0_i32_1 = arith.constant 0 : i32
    return %c0_i32, %c0_i32_0 : i32, i32
  }
  func.func @transform_4(%arg0: i32) -> (i32, i32) {
    %c0_i32 = arith.constant 0 : i32
    %c0_i32_0 = arith.constant 0 : i32
    %c0_i32_1 = arith.constant 0 : i32
    return %c0_i32, %c0_i32_0 : i32, i32
  }
  func.func @transform_5(%arg0: i32) -> (i32, i32) {
    %c0_i32 = arith.constant 0 : i32
    %c0_i32_0 = arith.constant 0 : i32
    %c0_i32_1 = arith.constant 0 : i32
    return %c0_i32, %c0_i32_0 : i32, i32
  }
  func.func @transform_6(%arg0: i32) -> (i32, i32) {
    %c0_i32 = arith.constant 0 : i32
    %c0_i32_0 = arith.constant 0 : i32
    %c0_i32_1 = arith.constant 0 : i32
    return %c0_i32, %c0_i32_0 : i32, i32
  }
}

</mosaic_0001>

<bundles_post_ra>
// kernel: discriminator_forward.4
= control target key start
LH: loop header
LB: loop body
LE: loop exit
PB: predicated region body
PF: predicated region fallthrough
CT: control target
= control target key end

     0   :  { %s1115_s9 = smov 0   ;;  %s1117_s10 = smov 0   ;;  %s1384_s0 = inlined_call_operand.vmem [shape: bf16[8,128], index: 0, kind: input, shape index: {}]   ;;  %s1385_s1 = inlined_call_operand.vmem [shape: bf16[128,2048], index: 1, kind: input, shape index: {}]   ;;  %s1386_s2 = inlined_call_operand.vmem [shape: bf16[8,2048], index: 2, kind: output, shape index: {}]  }
   0x1   :  { %s1119_s11 = smov 0  }
   0x2 LB: > { %s964_s12 = sadd.s32 4294967295, %s1097_s11   ;;  %s1132_s13 = sadd.s32 1, %s1097_s11   ;;  %s1097_s11 = sphi %s1119_s11, %s1389_s11   ;;  %s1093_s10 = sphi %s1117_s10, %s1388_s10   ;;  %s1089_s9 = sphi %s1115_s9, %s1387_s9  }
   0x3   : > { %s37_s14 = ssub.s32 %s1097_s11, %s1132_s13  ;;  %s40_s15 = sadd.s32 1, %s1093_s10 }
   0x4   : > { %p38_p0 = scmp.eq.s32.totalorder %s37_s14, 0  ;;  %p47_p1 = scmp.ne.s32.totalorder %s1093_s10, %s1089_s9 }
   0x5   : > { %p48_p2 = scmp.eq.s32.totalorder %s1097_s11, 0  ;;  %p967_p4 = scmp.ge.s32.totalorder %s1097_s11, 2 }
   0x6   : > { %s1141_s16 = scalar_select %p38_p0, %s1093_s10, %s40_s15  }
   0x7   : > { %p49_p3 = por %p48_p2, %p47_p1  ;;  %102 = sbr.rel (%p967_p4) target bundleno = 50 (0x32), region = 20 }
   0xe   : > { %105 = sbr.rel (!%p49_p3) target bundleno = 50 (0x32), region = 24  ;;  %s107_s17 = sand.u32 (%p49_p3), 1, %s1093_s10  }
   0xf   : > { %s1045_s18 = sshll.u32 (%p49_p3), %s1097_s11, 5  ;;  %s968_s19 = sshll.u32 (%p49_p3), %s107_s17, 9 }
  0x10   : > { %s1149_s22 = scalar_lea.vmem (%p49_p3), %s1385_s1, %s1045_s18  ;;  %s1154_s23 = scalar_lea.vmem (%p49_p3), [#allocation2], %s968_s19 }
  0x11   : > { %v125_v0 = vld [vmem:[%s1149_s22] sm:$0xff] (%p49_p3)  ;;  %v127_v1 = vld [vmem:[%s1149_s22 + $0x8] sm:$0xff] (%p49_p3)  ;;  %v129_v2 = vld [vmem:[%s1149_s22 + $0x10] sm:$0xff] (%p49_p3) }
  0x12   : > { %126 = vst [vmem:[%s1154_s23] sm:$0xff] (%p49_p3), %v125_v0  ;;  %128 = vst [vmem:[%s1154_s23 + $0x8] sm:$0xff] (%p49_p3), %v127_v1  ;;  %v131_v3 = vld [vmem:[%s1149_s22 + $0x18] sm:$0xff] (%p49_p3)  ;;  %v133_v4 = vld [vmem:[%s1149_s22 + $0x40] sm:$0xff] (%p49_p3) }
  0x13   : > { %130 = vst [vmem:[%s1154_s23 + $0x10] sm:$0xff] (%p49_p3), %v129_v2  ;;  %v135_v5 = vld [vmem:[%s1149_s22 + $0x48] sm:$0xff] (%p49_p3)  ;;  %132 = vst [vmem:[%s1154_s23 + $0x18] sm:$0xff] (%p49_p3), %v131_v3  ;;  %v137_v6 = vld [vmem:[%s1149_s22 + $0x50] sm:$0xff] (%p49_p3) }
  0x14   : > { %134 = vst [vmem:[%s1154_s23 + $0x20] sm:$0xff] (%p49_p3), %v133_v4  ;;  %136 = vst [vmem:[%s1154_s23 + $0x28] sm:$0xff] (%p49_p3), %v135_v5  ;;  %v139_v7 = vld [vmem:[%s1149_s22 + $0x58] sm:$0xff] (%p49_p3)  ;;  %v141_v8 = vld [vmem:[%s1149_s22 + $0x80] sm:$0xff] (%p49_p3) }
  0x15   : > { %138 = vst [vmem:[%s1154_s23 + $0x30] sm:$0xff] %v137_v6  ;;  %140 = vst [vmem:[%s1154_s23 + $0x38] sm:$0xff] %v139_v7  ;;  %v143_v9 = vld [vmem:[%s1149_s22 + $0x88] sm:$0xff]  ;;  %v145_v10 = vld [vmem:[%s1149_s22 + $0x90] sm:$0xff] }
  0x16   : > { %142 = vst [vmem:[%s1154_s23 + $0x40] sm:$0xff] %v141_v8  ;;  %v147_v11 = vld [vmem:[%s1149_s22 + $0x98] sm:$0xff]  ;;  %144 = vst [vmem:[%s1154_s23 + $0x48] sm:$0xff] %v143_v9  ;;  %v149_v12 = vld [vmem:[%s1149_s22 + $0xc0] sm:$0xff] }
  0x17   : > { %146 = vst [vmem:[%s1154_s23 + $0x50] sm:$0xff] %v145_v10  ;;  %148 = vst [vmem:[%s1154_s23 + $0x58] sm:$0xff] %v147_v11  ;;  %v151_v13 = vld [vmem:[%s1149_s22 + $0xc8] sm:$0xff]  ;;  %v153_v14 = vld [vmem:[%s1149_s22 + $0xd0] sm:$0xff] }
  0x18   : > { %150 = vst [vmem:[%s1154_s23 + $0x60] sm:$0xff] %v149_v12  ;;  %152 = vst [vmem:[%s1154_s23 + $0x68] sm:$0xff] %v151_v13  ;;  %v155_v15 = vld [vmem:[%s1149_s22 + $0xd8] sm:$0xff]  ;;  %v157_v16 = vld [vmem:[%s1149_s22 + $0x100] sm:$0xff] }
  0x19   : > { %154 = vst [vmem:[%s1154_s23 + $0x70] sm:$0xff] %v153_v14  ;;  %v159_v17 = vld [vmem:[%s1149_s22 + $0x108] sm:$0xff]  ;;  %156 = vst [vmem:[%s1154_s23 + $0x78] sm:$0xff] %v155_v15  ;;  %v161_v18 = vld [vmem:[%s1149_s22 + $0x110] sm:$0xff] }
  0x1a   : > { %158 = vst [vmem:[%s1154_s23 + $0x80] sm:$0xff] %v157_v16  ;;  %160 = vst [vmem:[%s1154_s23 + $0x88] sm:$0xff] %v159_v17  ;;  %v163_v19 = vld [vmem:[%s1149_s22 + $0x118] sm:$0xff]  ;;  %v165_v20 = vld [vmem:[%s1149_s22 + $0x140] sm:$0xff] }
  0x1b   : > { %162 = vst [vmem:[%s1154_s23 + $0x90] sm:$0xff] %v161_v18  ;;  %164 = vst [vmem:[%s1154_s23 + $0x98] sm:$0xff] %v163_v19  ;;  %v167_v21 = vld [vmem:[%s1149_s22 + $0x148] sm:$0xff]  ;;  %v169_v22 = vld [vmem:[%s1149_s22 + $0x150] sm:$0xff] }
  0x1c   : > { %166 = vst [vmem:[%s1154_s23 + $0xa0] sm:$0xff] %v165_v20  ;;  %v171_v23 = vld [vmem:[%s1149_s22 + $0x158] sm:$0xff]  ;;  %168 = vst [vmem:[%s1154_s23 + $0xa8] sm:$0xff] %v167_v21  ;;  %v173_v24 = vld [vmem:[%s1149_s22 + $0x180] sm:$0xff] }
  0x1d   : > { %170 = vst [vmem:[%s1154_s23 + $0xb0] sm:$0xff] %v169_v22  ;;  %172 = vst [vmem:[%s1154_s23 + $0xb8] sm:$0xff] %v171_v23  ;;  %v175_v25 = vld [vmem:[%s1149_s22 + $0x188] sm:$0xff]  ;;  %v177_v26 = vld [vmem:[%s1149_s22 + $0x190] sm:$0xff] }
  0x1e   : > { %174 = vst [vmem:[%s1154_s23 + $0xc0] sm:$0xff] %v173_v24  ;;  %176 = vst [vmem:[%s1154_s23 + $0xc8] sm:$0xff] %v175_v25  ;;  %v179_v27 = vld [vmem:[%s1149_s22 + $0x198] sm:$0xff]  ;;  %v181_v28 = vld [vmem:[%s1149_s22 + $0x1c0] sm:$0xff] }
  0x1f   : > { %178 = vst [vmem:[%s1154_s23 + $0xd0] sm:$0xff] %v177_v26  ;;  %v183_v29 = vld [vmem:[%s1149_s22 + $0x1c8] sm:$0xff]  ;;  %180 = vst [vmem:[%s1154_s23 + $0xd8] sm:$0xff] %v179_v27  ;;  %v185_v30 = vld [vmem:[%s1149_s22 + $0x1d0] sm:$0xff] }
  0x20   : > { %182 = vst [vmem:[%s1154_s23 + $0xe0] sm:$0xff] %v181_v28  ;;  %184 = vst [vmem:[%s1154_s23 + $0xe8] sm:$0xff] %v183_v29  ;;  %v187_v31 = vld [vmem:[%s1149_s22 + $0x1d8] sm:$0xff]  ;;  %v189_v32 = vld [vmem:[%s1149_s22 + $0x200] sm:$0xff] }
  0x21   : > { %186 = vst [vmem:[%s1154_s23 + $0xf0] sm:$0xff] %v185_v30  ;;  %188 = vst [vmem:[%s1154_s23 + $0xf8] sm:$0xff] %v187_v31  ;;  %v191_v33 = vld [vmem:[%s1149_s22 + $0x208] sm:$0xff]  ;;  %v193_v34 = vld [vmem:[%s1149_s22 + $0x210] sm:$0xff] }
  0x22   : > { %190 = vst [vmem:[%s1154_s23 + $0x100] sm:$0xff] %v189_v32  ;;  %v195_v35 = vld [vmem:[%s1149_s22 + $0x218] sm:$0xff]  ;;  %192 = vst [vmem:[%s1154_s23 + $0x108] sm:$0xff] %v191_v33  ;;  %v197_v36 = vld [vmem:[%s1149_s22 + $0x240] sm:$0xff] }
  0x23   : > { %194 = vst [vmem:[%s1154_s23 + $0x110] sm:$0xff] %v193_v34  ;;  %196 = vst [vmem:[%s1154_s23 + $0x118] sm:$0xff] %v195_v35  ;;  %v199_v37 = vld [vmem:[%s1149_s22 + $0x248] sm:$0xff]  ;;  %v201_v38 = vld [vmem:[%s1149_s22 + $0x250] sm:$0xff] }
  0x24   : > { %198 = vst [vmem:[%s1154_s23 + $0x120] sm:$0xff] %v197_v36  ;;  %200 = vst [vmem:[%s1154_s23 + $0x128] sm:$0xff] %v199_v37  ;;  %v203_v39 = vld [vmem:[%s1149_s22 + $0x258] sm:$0xff]  ;;  %v205_v40 = vld [vmem:[%s1149_s22 + $0x280] sm:$0xff] }
  0x25   : > { %202 = vst [vmem:[%s1154_s23 + $0x130] sm:$0xff] %v201_v38  ;;  %v207_v41 = vld [vmem:[%s1149_s22 + $0x288] sm:$0xff]  ;;  %204 = vst [vmem:[%s1154_s23 + $0x138] sm:$0xff] %v203_v39  ;;  %v209_v42 = vld [vmem:[%s1149_s22 + $0x290] sm:$0xff] }
  0x26   : > { %206 = vst [vmem:[%s1154_s23 + $0x140] sm:$0xff] %v205_v40  ;;  %208 = vst [vmem:[%s1154_s23 + $0x148] sm:$0xff] %v207_v41  ;;  %v211_v43 = vld [vmem:[%s1149_s22 + $0x298] sm:$0xff]  ;;  %v213_v44 = vld [vmem:[%s1149_s22 + $0x2c0] sm:$0xff] }
  0x27   : > { %210 = vst [vmem:[%s1154_s23 + $0x150] sm:$0xff] %v209_v42  ;;  %212 = vst [vmem:[%s1154_s23 + $0x158] sm:$0xff] %v211_v43  ;;  %v215_v45 = vld [vmem:[%s1149_s22 + $0x2c8] sm:$0xff]  ;;  %v217_v46 = vld [vmem:[%s1149_s22 + $0x2d0] sm:$0xff] }
  0x28   : > { %214 = vst [vmem:[%s1154_s23 + $0x160] sm:$0xff] %v213_v44  ;;  %v219_v47 = vld [vmem:[%s1149_s22 + $0x2d8] sm:$0xff]  ;;  %216 = vst [vmem:[%s1154_s23 + $0x168] sm:$0xff] %v215_v45  ;;  %v221_v48 = vld [vmem:[%s1149_s22 + $0x300] sm:$0xff] }
  0x29   : > { %218 = vst [vmem:[%s1154_s23 + $0x170] sm:$0xff] %v217_v46  ;;  %220 = vst [vmem:[%s1154_s23 + $0x178] sm:$0xff] %v219_v47  ;;  %v223_v49 = vld [vmem:[%s1149_s22 + $0x308] sm:$0xff]  ;;  %v225_v50 = vld [vmem:[%s1149_s22 + $0x310] sm:$0xff] }
  0x2a   : > { %222 = vst [vmem:[%s1154_s23 + $0x180] sm:$0xff] %v221_v48  ;;  %224 = vst [vmem:[%s1154_s23 + $0x188] sm:$0xff] %v223_v49  ;;  %v227_v51 = vld [vmem:[%s1149_s22 + $0x318] sm:$0xff]  ;;  %v229_v52 = vld [vmem:[%s1149_s22 + $0x340] sm:$0xff] }
  0x2b   : > { %226 = vst [vmem:[%s1154_s23 + $0x190] sm:$0xff] %v225_v50  ;;  %v231_v53 = vld [vmem:[%s1149_s22 + $0x348] sm:$0xff]  ;;  %228 = vst [vmem:[%s1154_s23 + $0x198] sm:$0xff] %v227_v51  ;;  %v233_v54 = vld [vmem:[%s1149_s22 + $0x350] sm:$0xff] }
  0x2c   : > { %230 = vst [vmem:[%s1154_s23 + $0x1a0] sm:$0xff] %v229_v52  ;;  %232 = vst [vmem:[%s1154_s23 + $0x1a8] sm:$0xff] %v231_v53  ;;  %v235_v55 = vld [vmem:[%s1149_s22 + $0x358] sm:$0xff]  ;;  %v237_v56 = vld [vmem:[%s1149_s22 + $0x380] sm:$0xff] }
  0x2d   : > { %234 = vst [vmem:[%s1154_s23 + $0x1b0] sm:$0xff] %v233_v54  ;;  %236 = vst [vmem:[%s1154_s23 + $0x1b8] sm:$0xff] %v235_v55  ;;  %v239_v57 = vld [vmem:[%s1149_s22 + $0x388] sm:$0xff]  ;;  %v241_v58 = vld [vmem:[%s1149_s22 + $0x390] sm:$0xff] }
  0x2e   : > { %238 = vst [vmem:[%s1154_s23 + $0x1c0] sm:$0xff] %v237_v56  ;;  %v243_v59 = vld [vmem:[%s1149_s22 + $0x398] sm:$0xff]  ;;  %240 = vst [vmem:[%s1154_s23 + $0x1c8] sm:$0xff] %v239_v57  ;;  %v245_v60 = vld [vmem:[%s1149_s22 + $0x3c0] sm:$0xff] }
  0x2f   : > { %242 = vst [vmem:[%s1154_s23 + $0x1d0] sm:$0xff] %v241_v58  ;;  %244 = vst [vmem:[%s1154_s23 + $0x1d8] sm:$0xff] %v243_v59  ;;  %v247_v61 = vld [vmem:[%s1149_s22 + $0x3c8] sm:$0xff]  ;;  %v249_v62 = vld [vmem:[%s1149_s22 + $0x3d0] sm:$0xff] }
  0x30   : > { %246 = vst [vmem:[%s1154_s23 + $0x1e0] sm:$0xff] %v245_v60  ;;  %248 = vst [vmem:[%s1154_s23 + $0x1e8] sm:$0xff] %v247_v61  ;;  %v251_v63 = vld [vmem:[%s1149_s22 + $0x3d8] sm:$0xff] }
  0x31   : > { %250 = vst [vmem:[%s1154_s23 + $0x1f0] sm:$0xff] %v249_v62  ;;  %252 = vst [vmem:[%s1154_s23 + $0x1f8] sm:$0xff] %v251_v63 }
  0x32 PF: > { %p971_p5 = scmp.ge.s32.totalorder %s1097_s11, 1  ;;  %p257_p6 = scmp.lt.s32.totalorder %s1097_s11, 3 }
  0x34   : > { %p258_p7 = pnand %p971_p5, %p257_p6 }
  0x35   : > { %s264_s24 = sand.u32 (!%p258_p7), 1, %s1089_s9   ;;  %v1099_v0 = vmov (!%p258_p7), 0   ;;  %s973_s29 = sshll.u32 (!%p258_p7), %s964_s12, 3 }
  0x36   : > { %261 = sbr.rel (%p258_p7) target bundleno = 344 (0x158), region = 47  ;;  %s972_s25 = sshll.u32 (!%p258_p7), %s264_s24, 9  ;;  %710 = vmatprep.mubr.bf16.mxu0 (!%p258_p7), %v1099_v0  ;;  %751 = vmatprep.mubr.bf16.mxu1 (!%p258_p7), %v1099_v0 }
  0x37   : > { %s1286_s26 = scalar_lea.vmem (!%p258_p7), [#allocation2], %s972_s25  ;;  %p287_p8 = scmp.lt.s32.totalorder (!%p258_p7), %s973_s29, 15 }
  0x38   : > { %v294_v1 = vld [vmem:[%s1286_s26] sm:$0xff] (!%p258_p7)  ;;  %v295_v3 = vld [vmem:[%s1286_s26 + $0x8] sm:$0xff] (!%p258_p7)  ;;  %v296_v63 = vld [vmem:[%s1286_s26 + $0x10] sm:$0xff] (!%p258_p7) }
  0x39   : > { %v298_v2 = vld [vmem:[%s1286_s26 + $0x20] sm:$0xff] (!%p258_p7)  ;;  %v299_v5 = vld [vmem:[%s1286_s26 + $0x28] sm:$0xff] (!%p258_p7) }
  0x3a   : > { %v976_v4 = vcombine.high (!%p258_p7), %v294_v1, %v298_v2  ;;  %v975_v6 = vcombine.low (!%p258_p7), %v294_v1, %v298_v2  ;;  %v302_v7 = vld [vmem:[%s1286_s26 + $0x40] sm:$0xff] (!%p258_p7)  ;;  %v978_v9 = vcombine.high (!%p258_p7), %v295_v3, %v299_v5  ;;  %v977_v10 = vcombine.low (!%p258_p7), %v295_v3, %v299_v5  ;;  %v303_v12 = vld [vmem:[%s1286_s26 + $0x48] sm:$0xff] (!%p258_p7)  ;;  %v300_v1 = vld [vmem:[%s1286_s26 + $0x30] sm:$0xff] (!%p258_p7) }
  0x3b   : > { %v306_v8 = vld [vmem:[%s1286_s26 + $0x60] sm:$0xff] (!%p258_p7)  ;;  %v307_v13 = vld [vmem:[%s1286_s26 + $0x68] sm:$0xff] (!%p258_p7)  ;;  %v297_v2 = vld [vmem:[%s1286_s26 + $0x18] sm:$0xff] (!%p258_p7) }
  0x3c   : > { %v984_v11 = vcombine.high (!%p258_p7), %v302_v7, %v306_v8  ;;  %v310_v14 = vld [vmem:[%s1286_s26 + $0x80] sm:$0xff] (!%p258_p7)  ;;  %678 = vmatprep.subr.bf16.mxu0 (!%p258_p7), %v976_v4  ;;  %v986_v15 = vcombine.high (!%p258_p7), %v303_v12, %v307_v13  ;;  %v311_v17 = vld [vmem:[%s1286_s26 + $0x88] sm:$0xff] (!%p258_p7)  ;;  %719 = vmatprep.subr.bf16.mxu1 (!%p258_p7), %v978_v9  ;;  %v983_v19 = vcombine.low (!%p258_p7), %v302_v7, %v306_v8  ;;  %v301_v3 = vld [vmem:[%s1286_s26 + $0x38] sm:$0xff] (!%p258_p7) }
  0x3d   : > { %v314_v16 = vld [vmem:[%s1286_s26 + $0xa0] sm:$0xff]  ;;  %v315_v18 = vld [vmem:[%s1286_s26 + $0xa8] sm:$0xff]  ;;  %679 = vmatpush1.bf16.msra.mxu0 %v975_v6  ;;  %720 = vmatpush1.bf16.msra.mxu1 %v977_v10  ;;  %v985_v20 = vcombine.low %v303_v12, %v307_v13  ;;  %v980_v6 = vcombine.high %v296_v63, %v300_v1  ;;  %v982_v7 = vcombine.high %v297_v2, %v301_v3  ;;  %v304_v8 = vld [vmem:[%s1286_s26 + $0x50] sm:$0xff]  ;;  %s1391_s29 = smov (!%p287_p8, %s973_s29), 15 }
  0x3e   : > { %680 = vmatprep.subr.bf16.mxu0 %v984_v11  ;;  %v992_v21 = vcombine.high %v310_v14, %v314_v16  ;;  %721 = vmatprep.subr.bf16.mxu1 %v986_v15  ;;  %v994_v22 = vcombine.high %v311_v17, %v315_v18  ;;  %v318_v23 = vld [vmem:[%s1286_s26 + $0xc0] sm:$0xff]  ;;  %v319_v25 = vld [vmem:[%s1286_s26 + $0xc8] sm:$0xff]  ;;  %v991_v27 = vcombine.low %v310_v14, %v314_v16  ;;  %v308_v9 = vld [vmem:[%s1286_s26 + $0x70] sm:$0xff]  ;;  %s974_s30 = sshll.u32 %s1391_s29, 2 }
  0x3f   : > { %v322_v24 = vld [vmem:[%s1286_s26 + $0xe0] sm:$0xff]  ;;  %v323_v26 = vld [vmem:[%s1286_s26 + $0xe8] sm:$0xff]  ;;  %v993_v28 = vcombine.low %v311_v17, %v315_v18  ;;  %v305_v10 = vld [vmem:[%s1286_s26 + $0x58] sm:$0xff]  ;;  %v979_v13 = vcombine.low %v296_v63, %v300_v1  ;;  %v981_v14 = vcombine.low %v297_v2, %v301_v3  ;;  %v988_v15 = vcombine.high %v304_v8, %v308_v9  ;;  %s1368_s5 = scalar_lea.vmem %s1386_s2, %s974_s30 }
  0x40   : > { %v1000_v29 = vcombine.high %v318_v23, %v322_v24  ;;  %v1002_v30 = vcombine.high %v319_v25, %v323_v26  ;;  %v326_v31 = vld [vmem:[%s1286_s26 + $0x100] sm:$0xff]  ;;  %v327_v33 = vld [vmem:[%s1286_s26 + $0x108] sm:$0xff]  ;;  %v999_v35 = vcombine.low %v318_v23, %v322_v24  ;;  %v1001_v36 = vcombine.low %v319_v25, %v323_v26  ;;  %v309_v11 = vld [vmem:[%s1286_s26 + $0x78] sm:$0xff] }
  0x41   : > { %681 = vmatpush1.bf16.msra.mxu0 %v983_v19  ;;  %722 = vmatpush1.bf16.msra.mxu1 %v985_v20  ;;  %v330_v32 = vld [vmem:[%s1286_s26 + $0x120] sm:$0xff]  ;;  %v331_v34 = vld [vmem:[%s1286_s26 + $0x128] sm:$0xff]  ;;  %v990_v16 = vcombine.high %v305_v10, %v309_v11  ;;  %v312_v17 = vld [vmem:[%s1286_s26 + $0x90] sm:$0xff] }
  0x42   : > { %682 = vmatprep.subr.bf16.mxu0 %v992_v21  ;;  %723 = vmatprep.subr.bf16.mxu1 %v994_v22  ;;  %v1008_v37 = vcombine.high %v326_v31, %v330_v32  ;;  %v1010_v38 = vcombine.high %v327_v33, %v331_v34  ;;  %v334_v39 = vld [vmem:[%s1286_s26 + $0x140] sm:$0xff]  ;;  %v335_v41 = vld [vmem:[%s1286_s26 + $0x148] sm:$0xff]  ;;  %v1007_v43 = vcombine.low %v326_v31, %v330_v32  ;;  %v316_v18 = vld [vmem:[%s1286_s26 + $0xb0] sm:$0xff] }
  0x43   : > { %v338_v40 = vld [vmem:[%s1286_s26 + $0x160] sm:$0xff]  ;;  %v339_v42 = vld [vmem:[%s1286_s26 + $0x168] sm:$0xff]  ;;  %v1009_v44 = vcombine.low %v327_v33, %v331_v34  ;;  %v313_v19 = vld [vmem:[%s1286_s26 + $0x98] sm:$0xff]  ;;  %v987_v21 = vcombine.low %v304_v8, %v308_v9  ;;  %v989_v22 = vcombine.low %v305_v10, %v309_v11  ;;  %v996_v23 = vcombine.high %v312_v17, %v316_v18 }
  0x44   : > { %v1016_v45 = vcombine.high %v334_v39, %v338_v40  ;;  %v1018_v46 = vcombine.high %v335_v41, %v339_v42  ;;  %v342_v47 = vld [vmem:[%s1286_s26 + $0x180] sm:$0xff]  ;;  %v343_v49 = vld [vmem:[%s1286_s26 + $0x188] sm:$0xff]  ;;  %v1015_v51 = vcombine.low %v334_v39, %v338_v40  ;;  %v1017_v52 = vcombine.low %v335_v41, %v339_v42  ;;  %v317_v20 = vld [vmem:[%s1286_s26 + $0xb8] sm:$0xff] }
  0x45   : > { %683 = vmatpush1.bf16.msra.mxu0 %v991_v27  ;;  %724 = vmatpush1.bf16.msra.mxu1 %v993_v28  ;;  %v346_v48 = vld [vmem:[%s1286_s26 + $0x1a0] sm:$0xff]  ;;  %v347_v50 = vld [vmem:[%s1286_s26 + $0x1a8] sm:$0xff]  ;;  %v998_v24 = vcombine.high %v313_v19, %v317_v20  ;;  %v320_v25 = vld [vmem:[%s1286_s26 + $0xd0] sm:$0xff] }
  0x46   : > { %684 = vmatprep.subr.bf16.mxu0 %v1000_v29  ;;  %725 = vmatprep.subr.bf16.mxu1 %v1002_v30  ;;  %v1024_v53 = vcombine.high %v342_v47, %v346_v48  ;;  %v1026_v54 = vcombine.high %v343_v49, %v347_v50  ;;  %v350_v55 = vld [vmem:[%s1286_s26 + $0x1c0] sm:$0xff]  ;;  %v351_v57 = vld [vmem:[%s1286_s26 + $0x1c8] sm:$0xff]  ;;  %v1023_v59 = vcombine.low %v342_v47, %v346_v48  ;;  %v324_v26 = vld [vmem:[%s1286_s26 + $0xf0] sm:$0xff] }
  0x47   : > { %v354_v56 = vld [vmem:[%s1286_s26 + $0x1e0] sm:$0xff]  ;;  %v355_v58 = vld [vmem:[%s1286_s26 + $0x1e8] sm:$0xff]  ;;  %v1025_v60 = vcombine.low %v343_v49, %v347_v50  ;;  %v321_v27 = vld [vmem:[%s1286_s26 + $0xd8] sm:$0xff]  ;;  %v995_v29 = vcombine.low %v312_v17, %v316_v18  ;;  %v997_v30 = vcombine.low %v313_v19, %v317_v20  ;;  %v1004_v31 = vcombine.high %v320_v25, %v324_v26 }
  0x48   : > { %v1032_v61 = vcombine.high %v350_v55, %v354_v56  ;;  %v1034_v62 = vcombine.high %v351_v57, %v355_v58  ;;  %v1031_v4 = vcombine.low %v350_v55, %v354_v56  ;;  %v1033_v5 = vcombine.low %v351_v57, %v355_v58  ;;  %v1331_v12 = vld [vmem:[%s1384_s0] sm:$0xf]  ;;  %v325_v28 = vld [vmem:[%s1286_s26 + $0xf8] sm:$0xff]  ;;  %v328_v33 = vld [vmem:[%s1286_s26 + $0x110] sm:$0xff] }
  0x49   : > { %685 = vmatpush1.bf16.msra.mxu0 %v999_v35  ;;  %726 = vmatpush1.bf16.msra.mxu1 %v1001_v36  ;;  %v1006_v32 = vcombine.high %v321_v27, %v325_v28  ;;  %v332_v34 = vld [vmem:[%s1286_s26 + $0x130] sm:$0xff]  ;;  %v329_v35 = vld [vmem:[%s1286_s26 + $0x118] sm:$0xff] }
  0x4a   : > { %686 = vmatprep.subr.bf16.mxu0 %v1008_v37  ;;  %727 = vmatprep.subr.bf16.mxu1 %v1010_v38  ;;  %v333_v36 = vld [vmem:[%s1286_s26 + $0x138] sm:$0xff]  ;;  %v1003_v37 = vcombine.low %v320_v25, %v324_v26  ;;  %v1012_v38 = vcombine.high %v328_v33, %v332_v34  ;;  %v336_v40 = vld [vmem:[%s1286_s26 + $0x150] sm:$0xff] }
  0x4b   : > { %v1014_v39 = vcombine.high %v329_v35, %v333_v36  ;;  %v340_v41 = vld [vmem:[%s1286_s26 + $0x170] sm:$0xff]  ;;  %v337_v42 = vld [vmem:[%s1286_s26 + $0x158] sm:$0xff] }
  0x4c   : > { %v344_v48 = vld [vmem:[%s1286_s26 + $0x190] sm:$0xff]  ;;  %v345_v50 = vld [vmem:[%s1286_s26 + $0x198] sm:$0xff] }
  0x4d   : > { %687 = vmatpush1.bf16.msra.mxu0 %v1007_v43  ;;  %728 = vmatpush1.bf16.msra.mxu1 %v1009_v44  ;;  %v341_v43 = vld [vmem:[%s1286_s26 + $0x178] sm:$0xff]  ;;  %v1011_v44 = vcombine.low %v328_v33, %v332_v34  ;;  %v348_v49 = vld [vmem:[%s1286_s26 + $0x1b0] sm:$0xff] }
  0x4e   : > { %688 = vmatprep.subr.bf16.mxu0 %v1016_v45  ;;  %729 = vmatprep.subr.bf16.mxu1 %v1018_v46  ;;  %v1013_v45 = vcombine.low %v329_v35, %v333_v36  ;;  %v1020_v46 = vcombine.high %v336_v40, %v340_v41  ;;  %v1022_v47 = vcombine.high %v337_v42, %v341_v43  ;;  %v352_v56 = vld [vmem:[%s1286_s26 + $0x1d0] sm:$0xff]  ;;  %v353_v58 = vld [vmem:[%s1286_s26 + $0x1d8] sm:$0xff] }
  0x4f   : > { %v356_v57 = vld [vmem:[%s1286_s26 + $0x1f0] sm:$0xff] }
  0x50   : > { %v1035_v1 = vcombine.low %v352_v56, %v356_v57 }
  0x51   : > { %689 = vmatpush1.bf16.msra.mxu0 %v1015_v51  ;;  %730 = vmatpush1.bf16.msra.mxu1 %v1017_v52  ;;  %v349_v51 = vld [vmem:[%s1286_s26 + $0x1b8] sm:$0xff]  ;;  %v1019_v52 = vcombine.low %v336_v40, %v340_v41 }
  0x52   : > { %690 = vmatprep.subr.bf16.mxu0 %v1024_v53  ;;  %731 = vmatprep.subr.bf16.mxu1 %v1026_v54  ;;  %v1021_v53 = vcombine.low %v337_v42, %v341_v43  ;;  %v1028_v54 = vcombine.high %v344_v48, %v348_v49  ;;  %v1030_v55 = vcombine.high %v345_v50, %v349_v51 }
  0x55   : > { %691 = vmatpush1.bf16.msra.mxu0 %v1023_v59  ;;  %732 = vmatpush1.bf16.msra.mxu1 %v1025_v60  ;;  %v357_v59 = vld [vmem:[%s1286_s26 + $0x1f8] sm:$0xff]  ;;  %v1027_v60 = vcombine.low %v344_v48, %v348_v49 }
  0x56   : > { %692 = vmatprep.subr.bf16.mxu0 %v1032_v61  ;;  %733 = vmatprep.subr.bf16.mxu1 %v1034_v62  ;;  %v1029_v61 = vcombine.low %v345_v50, %v349_v51  ;;  %v1036_v62 = vcombine.high %v352_v56, %v356_v57  ;;  %v1038_v63 = vcombine.high %v353_v58, %v357_v59 }
  0x57   : > { %v1037_v2 = vcombine.low %v353_v58, %v357_v59 }
  0x59   : > { %693 = vmatpush1.bf16.msra.mxu0 %v1031_v4  ;;  %734 = vmatpush1.bf16.msra.mxu1 %v1033_v5 }
  0x5a   : > { %760 = vmatprep.subr.bf16.mxu0 %v980_v6  ;;  %801 = vmatprep.subr.bf16.mxu1 %v982_v7 }
  0x5c   : > { %711 = vmatmul.mubr.bf16.vlgmr.msra.gmra.mrb[0].mxu0 %v1331_v12  ;;  %752 = vmatmul.mubr.bf16.vlgmr.msra.gmra.mrb[0].mxu1 %v1331_v12 }
  0x5d   : > { %761 = vmatpush1.bf16.msra.mxu0 %v979_v13  ;;  %802 = vmatpush1.bf16.msra.mxu1 %v981_v14 }
  0x5e   : > { %762 = vmatprep.subr.bf16.mxu0 %v988_v15  ;;  %803 = vmatprep.subr.bf16.mxu1 %v990_v16 }
  0x5f   : > { %792 = vmatprep.mubr.bf16.mxu0 %v1099_v0  ;;  %833 = vmatprep.mubr.bf16.mxu1 %v1099_v0  ;;  %v1005_v0 = vcombine.low %v321_v27, %v325_v28 }
  0x61   : > { %763 = vmatpush1.bf16.msra.mxu0 %v987_v21  ;;  %804 = vmatpush1.bf16.msra.mxu1 %v989_v22 }
  0x62   : > { %764 = vmatprep.subr.bf16.mxu0 %v996_v23  ;;  %805 = vmatprep.subr.bf16.mxu1 %v998_v24 }
  0x65   : > { %765 = vmatpush1.bf16.msra.mxu0 %v995_v29  ;;  %806 = vmatpush1.bf16.msra.mxu1 %v997_v30 }
  0x66   : > { %766 = vmatprep.subr.bf16.mxu0 %v1004_v31  ;;  %807 = vmatprep.subr.bf16.mxu1 %v1006_v32 }
  0x69   : > { %767 = vmatpush1.bf16.msra.mxu0 %v1003_v37  ;;  %808 = vmatpush1.bf16.msra.mxu1 %v1005_v0 }
  0x6a   : > { %768 = vmatprep.subr.bf16.mxu0 %v1012_v38  ;;  %809 = vmatprep.subr.bf16.mxu1 %v1014_v39 }
  0x6d   : > { %769 = vmatpush1.bf16.msra.mxu0 %v1011_v44  ;;  %810 = vmatpush1.bf16.msra.mxu1 %v1013_v45 }
  0x6e   : > { %770 = vmatprep.subr.bf16.mxu0 %v1020_v46  ;;  %811 = vmatprep.subr.bf16.mxu1 %v1022_v47 }
  0x71   : > { %771 = vmatpush1.bf16.msra.mxu0 %v1019_v52  ;;  %812 = vmatpush1.bf16.msra.mxu1 %v1021_v53 }
  0x72   : > { %772 = vmatprep.subr.bf16.mxu0 %v1028_v54  ;;  %813 = vmatprep.subr.bf16.mxu1 %v1030_v55 }
  0x75   : > { %773 = vmatpush1.bf16.msra.mxu0 %v1027_v60  ;;  %814 = vmatpush1.bf16.msra.mxu1 %v1029_v61 }
  0x76   : > { %774 = vmatprep.subr.bf16.mxu0 %v1036_v62  ;;  %815 = vmatprep.subr.bf16.mxu1 %v1038_v63 }
  0x79   : > { %775 = vmatpush1.bf16.msra.mxu0 %v1035_v1  ;;  %816 = vmatpush1.bf16.msra.mxu1 %v1037_v2 }
  0x7c   : > { %793 = vmatmul.mubr.bf16.vlgmr.msra.gmra.mrb[4].mxu0 %v1331_v12  ;;  %834 = vmatmul.mubr.bf16.vlgmr.msra.gmra.mrb[4].mxu1 %v1331_v12 }
 0x12f   : > { %v712_v3 = vpop.f32.mrb[0].mxu0  ;;  %v753_v5 = vpop.f32.mrb[0].mxu1 }
 0x130   : > { %vm842_vm0 = vcmp.ge.f32.partialorder %v712_v3, 0.0  ;;  %v850_v4 = vmul.f32 0.2, %v712_v3  ;;  %v714_v6 = vpop.f32.mrb[1].mxu0  ;;  %vm844_vm1 = vcmp.ge.f32.partialorder %v753_v5, 0.0  ;;  %v755_v10 = vpop.f32.mrb[1].mxu1 }
 0x131   : > { %v852_v7 = vmul.f32 0.2, %v753_v5  ;;  %vm843_vm2 = vcmp.ge.f32.partialorder %v714_v6, 0.0  ;;  %v851_v8 = vmul.f32 0.2, %v714_v6  ;;  %v716_v11 = vpop.f32.mrb[2].mxu0 }
 0x132   : > { %v858_v9 = vsel %vm842_vm0, %v712_v3, %v850_v4  ;;  %vm845_vm3 = vcmp.ge.f32.partialorder %v755_v10, 0.0  ;;  %v853_v14 = vmul.f32 0.2, %v755_v10  ;;  %v757_v15 = vpop.f32.mrb[2].mxu1  ;;  %v717_v16 = vpop.f32.mrb[3].mxu0 }
 0x133   : > { %v860_v13 = vsel %vm844_vm1, %v753_v5, %v852_v7  ;;  %v859_v12 = vsel %vm843_vm2, %v714_v6, %v851_v8  ;;  %v758_v18 = vpop.f32.mrb[3].mxu1 }
 0x134   : > { %v1046_v17 = vpack.c.bf16 %v859_v12, %v858_v9  ;;  %v861_v19 = vsel %vm845_vm3, %v755_v10, %v853_v14 }
 0x135   : > { %v1047_v20 = vpack.c.bf16 %v861_v19, %v860_v13 }
 0x136   : > { %898 = vst [vmem:[%s1368_s5] sm:$0xff] %v1046_v17 }
 0x137   : > { %899 = vst [vmem:[%s1368_s5 + $0x8] sm:$0xff] %v1047_v20 }
 0x14f   : > { %v794_v21 = vpop.f32.mrb[4].mxu0  ;;  %v835_v23 = vpop.f32.mrb[4].mxu1 }
 0x150   : > { %vm846_vm4 = vcmp.ge.f32.partialorder %v794_v21, 0.0  ;;  %v854_v22 = vmul.f32 0.2, %v794_v21  ;;  %v796_v24 = vpop.f32.mrb[5].mxu0  ;;  %vm848_vm5 = vcmp.ge.f32.partialorder %v835_v23, 0.0  ;;  %v837_v28 = vpop.f32.mrb[5].mxu1 }
 0x151   : > { %v856_v25 = vmul.f32 0.2, %v835_v23  ;;  %vm847_vm6 = vcmp.ge.f32.partialorder %v796_v24, 0.0  ;;  %v855_v26 = vmul.f32 0.2, %v796_v24  ;;  %v798_v29 = vpop.f32.mrb[6].mxu0 }
 0x152   : > { %v862_v27 = vsel %vm846_vm4, %v794_v21, %v854_v22  ;;  %vm849_vm7 = vcmp.ge.f32.partialorder %v837_v28, 0.0  ;;  %v857_v32 = vmul.f32 0.2, %v837_v28  ;;  %v839_v33 = vpop.f32.mrb[6].mxu1  ;;  %v799_v34 = vpop.f32.mrb[7].mxu0 }
 0x153   : > { %v864_v30 = vsel %vm848_vm5, %v835_v23, %v856_v25  ;;  %v863_v31 = vsel %vm847_vm6, %v796_v24, %v855_v26  ;;  %v840_v36 = vpop.f32.mrb[7].mxu1 }
 0x154   : > { %v1048_v35 = vpack.c.bf16 %v863_v31, %v862_v27  ;;  %v865_v37 = vsel %vm849_vm7, %v837_v28, %v857_v32 }
 0x155   : > { %v1049_v0 = vpack.c.bf16 %v865_v37, %v864_v30 }
 0x156   : > { %900 = vst [vmem:[%s1368_s5 + $0x10] sm:$0xff] %v1048_v35 }
 0x157   : > { %901 = vst [vmem:[%s1368_s5 + $0x18] sm:$0xff] %v1049_v0 }
 0x158 PF: > { %p9_p9 = scmp.ge.s32.totalorder %s1132_s13, 4   ;;  %s1387_s9 = smov %s1093_s10 }
 0x159   : > { %s1388_s10 = smov %s1141_s16  ;;  %s1389_s11 = smov %s1132_s13 }
 0x15a   :  { %11 = sbr.rel (!%p9_p9) target bundleno = 2 (0x2), region = 86 }

// kernel: discriminator_forward.5
= control target key start
LH: loop header
LB: loop body
LE: loop exit
PB: predicated region body
PF: predicated region fallthrough
CT: control target
= control target key end

     0   :  { %v547_v1 = vmov 0   ;;  %s736_s1 = inlined_call_operand.vmem [shape: bf16[128,512], index: 1, kind: input, shape index: {}]   ;;  %s737_s0 = inlined_call_operand.vmem [shape: bf16[16,128], index: 0, kind: input, shape index: {}]   ;;  %s738_s2 = inlined_call_operand.vmem [shape: f32[16,1], index: 2, kind: input, shape index: {}]   ;;  %s739_s3 = inlined_call_operand.vmem [shape: f32[16,1], index: 3, kind: input, shape index: {}]   ;;  %s740_s4 = inlined_call_operand.vmem [shape: bf16[16,512], index: 4, kind: output, shape index: {}]  }
   0x1   :  { %v494_v0 = vld [vmem:[%s736_s1 + $0x4] ss:$16 sps:$4 sm:$0xff]   ;;  %250 = vmatprep.mubr.bf16.mxu0 %v547_v1  ;;  %293 = vmatprep.mubr.bf16.mxu1 %v547_v1  ;;  %v496_v2 = vld [vmem:[%s736_s1 + $0xc] ss:$16 sps:$4 sm:$0xff]   ;;  %v498_v3 = vld [vmem:[%s736_s1] ss:$16 sps:$4 sm:$0xff]  }
   0x2   :  { %492 = vset.pattern.permute.xlu0 %v547_v1  ;;  %493 = vset.pattern.permute.xlu1 %v547_v1  ;;  %v499_v4 = vld [vmem:[%s736_s1 + $0x8] ss:$16 sps:$4 sm:$0xff]   ;;  %v500_v5 = vld [vmem:[%s736_s1 + $0x24] ss:$16 sps:$4 sm:$0xff]   ;;  %v502_v6 = vld [vmem:[%s736_s1 + $0x2c] ss:$16 sps:$4 sm:$0xff]  }
   0x3   :  { %218 = vmatprep.subr.bf16.mxu0 %v494_v0  ;;  %261 = vmatprep.subr.bf16.mxu1 %v496_v2  ;;  %v504_v7 = vld [vmem:[%s736_s1 + $0x20] ss:$16 sps:$4 sm:$0xff]   ;;  %v505_v8 = vld [vmem:[%s736_s1 + $0x28] ss:$16 sps:$4 sm:$0xff]   ;;  %v506_v9 = vld [vmem:[%s736_s1 + $0x44] ss:$16 sps:$4 sm:$0xff]  }
   0x4   :  { %219 = vmatpush1.bf16.msra.mxu0 %v498_v3  ;;  %262 = vmatpush1.bf16.msra.mxu1 %v499_v4  ;;  %v508_v10 = vld [vmem:[%s736_s1 + $0x4c] ss:$16 sps:$4 sm:$0xff]   ;;  %v510_v11 = vld [vmem:[%s736_s1 + $0x40] ss:$16 sps:$4 sm:$0xff]   ;;  %v511_v12 = vld [vmem:[%s736_s1 + $0x48] ss:$16 sps:$4 sm:$0xff]  }
   0x5   :  { %220 = vmatprep.subr.bf16.mxu0 %v500_v5  ;;  %263 = vmatprep.subr.bf16.mxu1 %v502_v6  ;;  %v512_v13 = vld [vmem:[%s736_s1 + $0x64] ss:$16 sps:$4 sm:$0xff]   ;;  %v514_v14 = vld [vmem:[%s736_s1 + $0x6c] ss:$16 sps:$4 sm:$0xff]   ;;  %v516_v15 = vld [vmem:[%s736_s1 + $0x60] ss:$16 sps:$4 sm:$0xff]  }
   0x6   :  { %v517_v16 = vld [vmem:[%s736_s1 + $0x68] ss:$16 sps:$4 sm:$0xff]   ;;  %v518_v17 = vld [vmem:[%s736_s1 + $0x84] ss:$16 sps:$4 sm:$0xff]   ;;  %v520_v18 = vld [vmem:[%s736_s1 + $0x8c] ss:$16 sps:$4 sm:$0xff]  }
   0x7   :  { %v522_v19 = vld [vmem:[%s736_s1 + $0x80] ss:$16 sps:$4 sm:$0xff]   ;;  %v523_v20 = vld [vmem:[%s736_s1 + $0x88] ss:$16 sps:$4 sm:$0xff]   ;;  %v524_v21 = vld [vmem:[%s736_s1 + $0xa4] ss:$16 sps:$4 sm:$0xff]  }
   0x8   :  { %221 = vmatpush1.bf16.msra.mxu0 %v504_v7  ;;  %264 = vmatpush1.bf16.msra.mxu1 %v505_v8  ;;  %v526_v22 = vld [vmem:[%s736_s1 + $0xac] ss:$16 sps:$4 sm:$0xff]   ;;  %v528_v23 = vld [vmem:[%s736_s1 + $0xa0] ss:$16 sps:$4 sm:$0xff]   ;;  %v529_v24 = vld [vmem:[%s736_s1 + $0xa8] ss:$16 sps:$4 sm:$0xff]  }
   0x9   :  { %222 = vmatprep.subr.bf16.mxu0 %v506_v9  ;;  %265 = vmatprep.subr.bf16.mxu1 %v508_v10  ;;  %v530_v25 = vld [vmem:[%s736_s1 + $0xc4] ss:$16 sps:$4 sm:$0xff]   ;;  %v532_v26 = vld [vmem:[%s736_s1 + $0xcc] ss:$16 sps:$4 sm:$0xff]   ;;  %v534_v27 = vld [vmem:[%s736_s1 + $0xc0] ss:$16 sps:$4 sm:$0xff]  }
   0xa   :  { %v535_v28 = vld [vmem:[%s736_s1 + $0xc8] ss:$16 sps:$4 sm:$0xff]   ;;  %v536_v29 = vld [vmem:[%s736_s1 + $0xe4] ss:$16 sps:$4 sm:$0xff]   ;;  %v538_v30 = vld [vmem:[%s736_s1 + $0xec] ss:$16 sps:$4 sm:$0xff]  }
   0xb   :  { %v540_v31 = vld [vmem:[%s736_s1 + $0xe0] ss:$16 sps:$4 sm:$0xff]   ;;  %v541_v32 = vld [vmem:[%s736_s1 + $0xe8] ss:$16 sps:$4 sm:$0xff]  }
   0xc   :  { %223 = vmatpush1.bf16.msra.mxu0 %v510_v11  ;;  %266 = vmatpush1.bf16.msra.mxu1 %v511_v12  ;;  %v542_v33 = vld [vmem:[%s737_s0] sm:$0xff]  }
   0xd   :  { %224 = vmatprep.subr.bf16.mxu0 %v512_v13  ;;  %267 = vmatprep.subr.bf16.mxu1 %v514_v14 }
  0x10   :  { %225 = vmatpush1.bf16.msra.mxu0 %v516_v15  ;;  %268 = vmatpush1.bf16.msra.mxu1 %v517_v16  ;;  %v304_v16 = vld [vmem:[%s738_s2] sm:$0xff] }
  0x11   :  { %226 = vmatprep.subr.bf16.mxu0 %v518_v17  ;;  %269 = vmatprep.subr.bf16.mxu1 %v520_v18 }
  0x14   :  { %227 = vmatpush1.bf16.msra.mxu0 %v522_v19  ;;  %270 = vmatpush1.bf16.msra.mxu1 %v523_v20  ;;  %v305_v19 = vld [vmem:[%s738_s2 + $0x8] sm:$0xff] }
  0x15   :  { %228 = vmatprep.subr.bf16.mxu0 %v524_v21  ;;  %271 = vmatprep.subr.bf16.mxu1 %v526_v22 }
  0x18   :  { %229 = vmatpush1.bf16.msra.mxu0 %v528_v23  ;;  %272 = vmatpush1.bf16.msra.mxu1 %v529_v24  ;;  %v306_v23 = vld [vmem:[%s739_s3] sm:$0xff] }
  0x19   :  { %230 = vmatprep.subr.bf16.mxu0 %v530_v25  ;;  %273 = vmatprep.subr.bf16.mxu1 %v532_v26  ;;  %v307_v26 = vld [vmem:[%s739_s3 + $0x8] sm:$0xff] }
  0x1c   :  { %231 = vmatpush1.bf16.msra.mxu0 %v534_v27  ;;  %274 = vmatpush1.bf16.msra.mxu1 %v535_v28 }
  0x1d   :  { %232 = vmatprep.subr.bf16.mxu0 %v536_v29  ;;  %275 = vmatprep.subr.bf16.mxu1 %v538_v30 }
  0x20   :  { %233 = vmatpush1.bf16.msra.mxu0 %v540_v31  ;;  %276 = vmatpush1.bf16.msra.mxu1 %v541_v32 }
  0x23   :  { %251 = vmatmul.mubr.bf16.vlgmr.msra.gmra.mrb[0].mxu0 %v542_v33  ;;  %294 = vmatmul.mubr.bf16.vlgmr.msra.gmra.mrb[0].mxu1 %v542_v33 }
  0xf6   :  { %v672_v34 = vpop.f32.mrb[0].mxu0  ;;  %v674_v35 = vpop.f32.mrb[0].mxu1 }
  0xf7   :  { %v676_v36 = vpop.f32.mrb[1].mxu0  ;;  %v678_v37 = vpop.f32.mrb[1].mxu1 }
  0xf8   :  { %v308_v38 = vadd.f32 %v676_v36, %v672_v34  ;;  %v682_v39 = vpop.f32.mrb[2].mxu0  ;;  %v684_v40 = vpop.f32.mrb[2].mxu1 }
  0xf9   :  { %v686_v41 = vpop.f32.mrb[3].mxu0  ;;  %v688_v42 = vpop.f32.mrb[3].mxu1 }
  0xfa   :  { %v313_v43 = vadd.f32 %v686_v41, %v682_v39  ;;  %v309_v44 = vadd.f32 %v308_v38, %v674_v35 }
  0xfc   :  { %v310_v45 = vadd.f32 %v309_v44, %v678_v37  ;;  %v314_v46 = vadd.f32 %v313_v43, %v684_v40 }
  0xfe   :  { %311 = vadd.xlane.f32.xlu0 %v310_v45  ;;  %v315_v47 = vadd.f32 %v314_v46, %v688_v42 }
 0x102   :  { %316 = vadd.xlane.f32.xlu0 %v315_v47 }
 0x18b   :  { %v312_v48 = vpop.xlane.xlu0 %311 }
 0x18c   :  { %v318_v49 = vmul.f32 0.001953125, %v312_v48 }
 0x18e   :  { %v320_v50 = vsub.f32 %v672_v34, %v318_v49  ;;  %v321_v51 = vsub.f32 %v676_v36, %v318_v49  ;;  %v322_v52 = vsub.f32 %v674_v35, %v318_v49  ;;  %v323_v54 = vsub.f32 %v678_v37, %v318_v49 }
 0x18f   :  { %v317_v53 = vpop.xlane.xlu0 %316 }
 0x190   :  { %v319_v55 = vmul.f32 0.001953125, %v317_v53  ;;  %v328_v56 = vmul.f32 %v320_v50, %v320_v50  ;;  %v329_v57 = vmul.f32 %v321_v51, %v321_v51  ;;  %v330_v58 = vmul.f32 %v322_v52, %v322_v52 }
 0x191   :  { %v331_v63 = vmul.f32 %v323_v54, %v323_v54 }
 0x192   :  { %v336_v59 = vadd.f32 %v329_v57, %v328_v56  ;;  %v324_v60 = vsub.f32 %v682_v39, %v319_v55  ;;  %v325_v61 = vsub.f32 %v686_v41, %v319_v55  ;;  %v326_v62 = vsub.f32 %v684_v40, %v319_v55 }
 0x193   :  { %v327_v1 = vsub.f32 %v688_v42, %v319_v55 }
 0x194   :  { %v337_v0 = vadd.f32 %v336_v59, %v330_v58  ;;  %v332_v2 = vmul.f32 %v324_v60, %v324_v60  ;;  %v333_v3 = vmul.f32 %v325_v61, %v325_v61  ;;  %v334_v5 = vmul.f32 %v326_v62, %v326_v62 }
 0x195   :  { %v335_v7 = vmul.f32 %v327_v1, %v327_v1 }
 0x196   :  { %v338_v4 = vadd.f32 %v337_v0, %v331_v63  ;;  %v341_v6 = vadd.f32 %v333_v3, %v332_v2 }
 0x198   :  { %339 = vadd.xlane.f32.xlu1 %v338_v4  ;;  %v342_v8 = vadd.f32 %v341_v6, %v334_v5 }
 0x19a   :  { %v343_v9 = vadd.f32 %v342_v8, %v335_v7 }
 0x19c   :  { %344 = vadd.xlane.f32.xlu1 %v343_v9 }
 0x225   :  { %v340_v10 = vpop.xlane.xlu1 %339 }
 0x226   :  { %v346_v11 = vmul.f32 0.001953125, %v340_v10 }
 0x228   :  { %v348_v12 = vadd.f32 1e-05, %v346_v11 }
 0x229   :  { %v345_v13 = vpop.xlane.xlu1 %344 }
 0x22a   :  { %543 = vrsqrt.f32 %v348_v12  ;;  %v347_v14 = vmul.f32 0.001953125, %v345_v13 }
 0x22c   :  { %v349_v15 = vadd.f32 1e-05, %v347_v14 }
 0x22e   :  { %545 = vrsqrt.f32 %v349_v15 }
 0x234   :  { %v544_v17 = vpop.eup %543 }
 0x235   :  { %v352_v18 = vmul.f32 %v544_v17, %v304_v16 }
 0x237   :  { %360 = vperm.xlu0 %492, %v352_v18   ;;  %v354_v22 = vmul.f32 %v352_v18, %v318_v49 }
 0x238   :  { %v546_v20 = vpop.eup %545 }
 0x239   :  { %v353_v21 = vmul.f32 %v546_v20, %v305_v19  ;;  %v356_v24 = vsub.f32 %v306_v23, %v354_v22 }
 0x23b   :  { %365 = vperm.xlu1 %493, %v353_v21   ;;  %v355_v25 = vmul.f32 %v353_v21, %v319_v55 }
 0x23d   :  { %v357_v27 = vsub.f32 %v307_v26, %v355_v25 }
 0x23f   :  { %378 = vperm.xlu1 %493, %v356_v24  }
 0x243   :  { %383 = vperm.xlu1 %493, %v357_v27  }
 0x2b6   :  { %v361_v28 = vpop.permute.xlu0 %360 }
 0x2b7   :  { %v368_v30 = vmul.f32 %v361_v28, %v672_v34  ;;  %v369_v31 = vmul.f32 %v361_v28, %v676_v36  ;;  %v370_v32 = vmul.f32 %v361_v28, %v674_v35  ;;  %v371_v33 = vmul.f32 %v361_v28, %v678_v37 }
 0x2ba   :  { %v366_v29 = vpop.permute.xlu1 %365 }
 0x2bb   :  { %v372_v47 = vmul.f32 %v366_v29, %v682_v39  ;;  %v373_v48 = vmul.f32 %v366_v29, %v686_v41  ;;  %v374_v49 = vmul.f32 %v366_v29, %v684_v40  ;;  %v375_v37 = vmul.f32 %v366_v29, %v688_v42 }
 0x2be   :  { %v379_v38 = vpop.permute.xlu1 %378 }
 0x2bf   :  { %v386_v43 = vadd.f32 %v379_v38, %v368_v30  ;;  %v387_v44 = vadd.f32 %v379_v38, %v369_v31  ;;  %v388_v45 = vadd.f32 %v379_v38, %v370_v32  ;;  %v389_v46 = vadd.f32 %v379_v38, %v371_v33 }
 0x2c1   :  { %vm394_vm0 = vcmp.ge.f32.partialorder %v386_v43, 0.0  ;;  %vm395_vm1 = vcmp.ge.f32.partialorder %v387_v44, 0.0  ;;  %vm396_vm2 = vcmp.ge.f32.partialorder %v388_v45, 0.0  ;;  %vm397_vm3 = vcmp.ge.f32.partialorder %v389_v46, 0.0 }
 0x2c2   :  { %v402_v34 = vmul.f32 0.2, %v386_v43  ;;  %v403_v36 = vmul.f32 0.2, %v387_v44  ;;  %v404_v35 = vmul.f32 0.2, %v388_v45  ;;  %v384_v50 = vpop.permute.xlu1 %383 }
 0x2c3   :  { %v405_v51 = vmul.f32 0.2, %v389_v46  ;;  %v390_v52 = vadd.f32 %v384_v50, %v372_v47  ;;  %v391_v53 = vadd.f32 %v384_v50, %v373_v48  ;;  %v392_v54 = vadd.f32 %v384_v50, %v374_v49 }
 0x2c4   :  { %v410_v55 = vsel %vm394_vm0, %v386_v43, %v402_v34  ;;  %v411_v39 = vsel %vm395_vm1, %v387_v44, %v403_v36  ;;  %v412_v56 = vsel %vm396_vm2, %v388_v45, %v404_v35  ;;  %v393_v41 = vadd.f32 %v384_v50, %v375_v37 }
 0x2c5   :  { %v413_v57 = vsel %vm397_vm3, %v389_v46, %v405_v51  ;;  %v487_v40 = vpack.c.bf16 %v411_v39, %v410_v55  ;;  %vm398_vm4 = vcmp.ge.f32.partialorder %v390_v52, 0.0  ;;  %vm399_vm5 = vcmp.ge.f32.partialorder %v391_v53, 0.0 }
 0x2c6   :  { %v488_v58 = vpack.c.bf16 %v413_v57, %v412_v56  ;;  %vm400_vm6 = vcmp.ge.f32.partialorder %v392_v54, 0.0  ;;  %vm401_vm7 = vcmp.ge.f32.partialorder %v393_v41, 0.0  ;;  %v406_v59 = vmul.f32 0.2, %v390_v52 }
 0x2c7   :  { %442 = vst [vmem:[%s740_s4] sm:$0xff] %v487_v40  ;;  %v407_v42 = vmul.f32 0.2, %v391_v53  ;;  %v408_v60 = vmul.f32 0.2, %v392_v54  ;;  %v409_v61 = vmul.f32 0.2, %v393_v41 }
 0x2c8   :  { %443 = vst [vmem:[%s740_s4 + $0x8] sm:$0xff] %v488_v58  ;;  %v414_v62 = vsel %vm398_vm4, %v390_v52, %v406_v59 }
 0x2c9   :  { %v415_v63 = vsel %vm399_vm5, %v391_v53, %v407_v42  ;;  %v416_v0 = vsel %vm400_vm6, %v392_v54, %v408_v60  ;;  %v417_v1 = vsel %vm401_vm7, %v393_v41, %v409_v61 }
 0x2ca   :  { %v489_v2 = vpack.c.bf16 %v415_v63, %v414_v62  ;;  %v490_v3 = vpack.c.bf16 %v417_v1, %v416_v0 }
 0x2cc   :  { %444 = vst [vmem:[%s740_s4 + $0x10] sm:$0xff] %v489_v2  ;;  %445 = vst [vmem:[%s740_s4 + $0x18] sm:$0xff] %v490_v3 }

// kernel: discriminator_forward.6
= control target key start
LH: loop header
LB: loop body
LE: loop exit
PB: predicated region body
PF: predicated region fallthrough
CT: control target
= control target key end

     0   :  { %v479_v48 = vmov 0   ;;  %s615_s1 = inlined_call_operand.vmem [shape: bf16[256,128], index: 1, kind: input, shape index: {}]   ;;  %s616_s0 = inlined_call_operand.vmem [shape: bf16[32,256], index: 0, kind: input, shape index: {}]   ;;  %s617_s2 = inlined_call_operand.vmem [shape: f32[32,1], index: 2, kind: input, shape index: {}]   ;;  %s618_s3 = inlined_call_operand.vmem [shape: f32[32,1], index: 3, kind: input, shape index: {}]   ;;  %s619_s4 = inlined_call_operand.vmem [shape: bf16[32,128], index: 4, kind: output, shape index: {}]  }
   0x1   :  { %v449_v0 = vld [vmem:[%s615_s1 + $0x40] sm:$0xff]   ;;  %v451_v2 = vld [vmem:[%s615_s1 + $0x48] sm:$0xff]   ;;  %v453_v4 = vld [vmem:[%s615_s1 + $0x50] sm:$0xff]   ;;  %447 = vset.pattern.permute.xlu0 %v479_v48  ;;  %448 = vset.pattern.permute.xlu1 %v479_v48 }
   0x2   :  { %v450_v1 = vld [vmem:[%s615_s1] sm:$0xff]   ;;  %402 = vmatprep.subr.bf16.mxu0 %v449_v0  ;;  %430 = vmatprep.subr.bf16.mxu1 %v449_v0  ;;  %v452_v3 = vld [vmem:[%s615_s1 + $0x8] sm:$0xff]   ;;  %v454_v5 = vld [vmem:[%s615_s1 + $0x10] sm:$0xff]  }
   0x3   :  { %403 = vmatpush3.bf16.msra.mxu0 %v450_v1  ;;  %438 = vmatpush3.bf16.msra.mxu1 %v450_v1  ;;  %v455_v6 = vld [vmem:[%s615_s1 + $0x58] sm:$0xff]   ;;  %v457_v8 = vld [vmem:[%s615_s1 + $0x60] sm:$0xff]   ;;  %v459_v10 = vld [vmem:[%s615_s1 + $0x68] sm:$0xff]  }
   0x4   :  { %404 = vmatprep.subr.bf16.mxu0 %v451_v2  ;;  %431 = vmatprep.subr.bf16.mxu1 %v451_v2  ;;  %v456_v7 = vld [vmem:[%s615_s1 + $0x18] sm:$0xff]   ;;  %v458_v9 = vld [vmem:[%s615_s1 + $0x20] sm:$0xff]   ;;  %v460_v13 = vld [vmem:[%s615_s1 + $0x28] sm:$0xff]  }
   0x5   :  { %v467_v11 = vld [vmem:[%s616_s0 + $0x4] ss:$8 sps:$4 sm:$0xff]   ;;  %v470_v12 = vld [vmem:[%s616_s0 + $0x14] ss:$8 sps:$4 sm:$0xff]   ;;  %v465_v18 = vld [vmem:[%s616_s0] ss:$8 sps:$4 sm:$0xff]  }
   0x6   :  { %v461_v14 = vld [vmem:[%s615_s1 + $0x70] sm:$0xff]   ;;  %202 = vmatprep.mubr.bf16.mxu0 %v467_v11  ;;  %210 = vmatprep.mubr.bf16.mxu1 %v470_v12  ;;  %v463_v16 = vld [vmem:[%s615_s1 + $0x78] sm:$0xff]   ;;  %v219_v61 = vld [vmem:[%s617_s2] sm:$0xff] }
   0x7   :  { %405 = vmatpush3.bf16.msra.mxu0 %v452_v3  ;;  %439 = vmatpush3.bf16.msra.mxu1 %v452_v3  ;;  %v462_v15 = vld [vmem:[%s615_s1 + $0x30] sm:$0xff]   ;;  %v464_v17 = vld [vmem:[%s615_s1 + $0x38] sm:$0xff]  }
   0x8   :  { %406 = vmatprep.subr.bf16.mxu0 %v453_v4  ;;  %432 = vmatprep.subr.bf16.mxu1 %v453_v4  ;;  %v468_v19 = vld [vmem:[%s616_s0 + $0x10] ss:$8 sps:$4 sm:$0xff]   ;;  %v220_v4 = vld [vmem:[%s617_s2 + $0x8] sm:$0xff] }
   0x9   :  { %v221_v0 = vld [vmem:[%s617_s2 + $0x10] sm:$0xff] }
   0xb   :  { %407 = vmatpush3.bf16.msra.mxu0 %v454_v5  ;;  %440 = vmatpush3.bf16.msra.mxu1 %v454_v5 }
   0xc   :  { %408 = vmatprep.subr.bf16.mxu0 %v455_v6  ;;  %433 = vmatprep.subr.bf16.mxu1 %v455_v6 }
   0xf   :  { %409 = vmatpush3.bf16.msra.mxu0 %v456_v7  ;;  %441 = vmatpush3.bf16.msra.mxu1 %v456_v7  ;;  %v222_v7 = vld [vmem:[%s617_s2 + $0x18] sm:$0xff] }
  0x10   :  { %410 = vmatprep.subr.bf16.mxu0 %v457_v8  ;;  %434 = vmatprep.subr.bf16.mxu1 %v457_v8 }
  0x13   :  { %411 = vmatpush3.bf16.msra.mxu0 %v458_v9  ;;  %442 = vmatpush3.bf16.msra.mxu1 %v458_v9 }
  0x14   :  { %412 = vmatprep.subr.bf16.mxu0 %v459_v10  ;;  %435 = vmatprep.subr.bf16.mxu1 %v459_v10  ;;  %v223_v10 = vld [vmem:[%s618_s3] sm:$0xff] }
  0x17   :  { %413 = vmatpush3.bf16.msra.mxu0 %v460_v13  ;;  %443 = vmatpush3.bf16.msra.mxu1 %v460_v13  ;;  %v225_v13 = vld [vmem:[%s618_s3 + $0x10] sm:$0xff] }
  0x18   :  { %414 = vmatprep.subr.bf16.mxu0 %v461_v14  ;;  %436 = vmatprep.subr.bf16.mxu1 %v461_v14 }
  0x1b   :  { %415 = vmatpush3.bf16.msra.mxu0 %v462_v15  ;;  %444 = vmatpush3.bf16.msra.mxu1 %v462_v15 }
  0x1c   :  { %416 = vmatprep.subr.bf16.mxu0 %v463_v16  ;;  %437 = vmatprep.subr.bf16.mxu1 %v463_v16  ;;  %v224_v16 = vld [vmem:[%s618_s3 + $0x8] sm:$0xff] }
  0x1f   :  { %417 = vmatpush3.bf16.msra.mxu0 %v464_v17  ;;  %445 = vmatpush3.bf16.msra.mxu1 %v464_v17 }
  0x22   :  { %203 = vmatmul.mubr.bf16.vlgmr.msra.gmra.mrb[0].mxu0 %v465_v18  ;;  %211 = vmatmul.mubr.bf16.vlgmr.msra.gmra.mrb[0].mxu1 %v468_v19  ;;  %v226_v19 = vld [vmem:[%s618_s3 + $0x18] sm:$0xff] }
  0xf5   :  { %v418_v20 = vpop.f32.mrb[0].mxu0  ;;  %v424_v21 = vpop.f32.mrb[0].mxu1 }
  0xf6   :  { %v419_v22 = vpop.f32.mrb[1].mxu0  ;;  %v425_v23 = vpop.f32.mrb[1].mxu1 }
  0xf7   :  { %v565_v24 = vadd.f32 %v419_v22, %v418_v20  ;;  %v567_v25 = vadd.f32 %v425_v23, %v424_v21  ;;  %v421_v26 = vpop.f32.mrb[2].mxu0  ;;  %v427_v27 = vpop.f32.mrb[2].mxu1 }
  0xf8   :  { %v422_v28 = vpop.f32.mrb[3].mxu0  ;;  %v428_v29 = vpop.f32.mrb[3].mxu1 }
  0xf9   :  { %v569_v30 = vadd.f32 %v422_v28, %v421_v26  ;;  %v571_v31 = vadd.f32 %v428_v29, %v427_v27  ;;  %231 = vadd.xlane.f32.xlu1 %v567_v25  ;;  %227 = vadd.xlane.f32.xlu0 %v565_v24 }
  0xfd   :  { %233 = vadd.xlane.f32.xlu1 %v571_v31  ;;  %229 = vadd.xlane.f32.xlu0 %v569_v30 }
 0x186   :  { %v232_v32 = vpop.xlane.xlu1 %231  ;;  %v228_v33 = vpop.xlane.xlu0 %227 }
 0x187   :  { %v237_v34 = vmul.f32 0.0078125, %v232_v32  ;;  %v235_v35 = vmul.f32 0.0078125, %v228_v33 }
 0x189   :  { %v239_v36 = vsub.f32 %v565_v24, %v235_v35  ;;  %v241_v42 = vsub.f32 %v567_v25, %v237_v34 }
 0x18a   :  { %v234_v37 = vpop.xlane.xlu1 %233  ;;  %v230_v38 = vpop.xlane.xlu0 %229 }
 0x18b   :  { %v238_v39 = vmul.f32 0.0078125, %v234_v37  ;;  %v236_v40 = vmul.f32 0.0078125, %v230_v38  ;;  %v243_v41 = vmul.f32 %v239_v36, %v239_v36  ;;  %v245_v44 = vmul.f32 %v241_v42, %v241_v42 }
 0x18d   :  { %247 = vadd.xlane.f32.xlu0 %v243_v41  ;;  %v240_v43 = vsub.f32 %v569_v30, %v236_v40  ;;  %v242_v46 = vsub.f32 %v571_v31, %v238_v39 }
 0x18f   :  { %v244_v45 = vmul.f32 %v240_v43, %v240_v43  ;;  %v246_v47 = vmul.f32 %v242_v46, %v242_v46 }
 0x191   :  { %251 = vadd.xlane.f32.xlu0 %v245_v44  ;;  %249 = vadd.xlane.f32.xlu1 %v244_v45 }
 0x195   :  { %253 = vadd.xlane.f32.xlu1 %v246_v47 }
 0x21a   :  { %v248_v49 = vpop.xlane.xlu0 %247 }
 0x21b   :  { %v255_v50 = vmul.f32 0.0078125, %v248_v49 }
 0x21d   :  { %v259_v51 = vadd.f32 1e-05, %v255_v50 }
 0x21e   :  { %v250_v52 = vpop.xlane.xlu1 %249  ;;  %v252_v53 = vpop.xlane.xlu0 %251 }
 0x21f   :  { %471 = vrsqrt.f32 %v259_v51  ;;  %v256_v54 = vmul.f32 0.0078125, %v250_v52  ;;  %v257_v55 = vmul.f32 0.0078125, %v252_v53 }
 0x221   :  { %v261_v56 = vadd.f32 1e-05, %v257_v55  ;;  %v260_v57 = vadd.f32 1e-05, %v256_v54 }
 0x222   :  { %v254_v58 = vpop.xlane.xlu1 %253 }
 0x223   :  { %v258_v59 = vmul.f32 0.0078125, %v254_v58  ;;  %473 = vrsqrt.f32 %v261_v56 }
 0x224   :  { %475 = vrsqrt.f32 %v260_v57 }
 0x225   :  { %v262_v60 = vadd.f32 1e-05, %v258_v59 }
 0x227   :  { %477 = vrsqrt.f32 %v262_v60 }
 0x229   :  { %v472_v62 = vpop.eup %471 }
 0x22a   :  { %v267_v63 = vmul.f32 %v472_v62, %v219_v61 }
 0x22c   :  { %281 = vperm.xlu0 %447, %v267_v63   ;;  %v271_v9 = vmul.f32 %v267_v63, %v235_v35 }
 0x22d   :  { %v474_v1 = vpop.eup %473 }
 0x22e   :  { %v269_v2 = vmul.f32 %v474_v1, %v221_v0  ;;  %v476_v3 = vpop.eup %475  ;;  %v275_v11 = vsub.f32 %v223_v10, %v271_v9 }
 0x22f   :  { %v268_v5 = vmul.f32 %v476_v3, %v220_v4 }
 0x230   :  { %291 = vperm.xlu1 %448, %v269_v2   ;;  %v273_v12 = vmul.f32 %v269_v2, %v237_v34 }
 0x231   :  { %v478_v6 = vpop.eup %477  ;;  %v272_v15 = vmul.f32 %v268_v5, %v236_v40 }
 0x232   :  { %v270_v8 = vmul.f32 %v478_v6, %v222_v7  ;;  %v277_v14 = vsub.f32 %v225_v13, %v273_v12 }
 0x233   :  { %v276_v17 = vsub.f32 %v224_v16, %v272_v15 }
 0x234   :  { %286 = vperm.xlu1 %448, %v268_v5   ;;  %v274_v18 = vmul.f32 %v270_v8, %v238_v39 }
 0x236   :  { %v278_v20 = vsub.f32 %v226_v19, %v274_v18 }
 0x238   :  { %296 = vperm.xlu1 %448, %v270_v8  }
 0x23c   :  { %305 = vperm.xlu1 %448, %v275_v11  }
 0x240   :  { %315 = vperm.xlu1 %448, %v277_v14  }
 0x244   :  { %310 = vperm.xlu1 %448, %v276_v17  }
 0x248   :  { %320 = vperm.xlu1 %448, %v278_v20  }
 0x2ab   :  { %v282_v26 = vpop.permute.xlu0 %281 }
 0x2ac   :  { %v299_v28 = vmul.f32 %v565_v24, %v282_v26 }
 0x2af   :  { %v292_v21 = vpop.permute.xlu1 %291 }
 0x2b0   :  { %v301_v33 = vmul.f32 %v567_v25, %v292_v21 }
 0x2b3   :  { %v287_v22 = vpop.permute.xlu1 %286 }
 0x2b4   :  { %v300_v34 = vmul.f32 %v569_v30, %v287_v22 }
 0x2b7   :  { %v297_v23 = vpop.permute.xlu1 %296 }
 0x2b8   :  { %v302_v39 = vmul.f32 %v571_v31, %v297_v23 }
 0x2bb   :  { %v306_v27 = vpop.permute.xlu1 %305 }
 0x2bc   :  { %v323_v32 = vadd.f32 %v306_v27, %v299_v28 }
 0x2be   :  { %v331_v36 = vmul.f32 0.2, %v323_v32  ;;  %vm327_vm0 = vcmp.ge.f32.partialorder %v323_v32, 0.0 }
 0x2bf   :  { %v316_v29 = vpop.permute.xlu1 %315 }
 0x2c0   :  { %v325_v37 = vadd.f32 %v316_v29, %v301_v33  ;;  %v335_v42 = vsel %vm327_vm0, %v323_v32, %v331_v36 }
 0x2c2   :  { %v333_v43 = vmul.f32 0.2, %v325_v37  ;;  %vm329_vm2 = vcmp.ge.f32.partialorder %v325_v37, 0.0 }
 0x2c3   :  { %v311_v35 = vpop.permute.xlu1 %310 }
 0x2c4   :  { %v324_v38 = vadd.f32 %v311_v35, %v300_v34  ;;  %v337_v30 = vsel %vm329_vm2, %v325_v37, %v333_v43 }
 0x2c6   :  { %vm328_vm1 = vcmp.ge.f32.partialorder %v324_v38, 0.0  ;;  %v332_v40 = vmul.f32 0.2, %v324_v38 }
 0x2c7   :  { %v321_v41 = vpop.permute.xlu1 %320 }
 0x2c8   :  { %v336_v44 = vsel %vm328_vm1, %v324_v38, %v332_v40  ;;  %v326_v24 = vadd.f32 %v321_v41, %v302_v39 }
 0x2c9   :  { %v394_v45 = vpack.c.bf16 %v336_v44, %v335_v42 }
 0x2ca   :  { %vm330_vm3 = vcmp.ge.f32.partialorder %v326_v24, 0.0  ;;  %v334_v25 = vmul.f32 0.2, %v326_v24 }
 0x2cb   :  { %395 = vst [vmem:[%s619_s4] sm:$0xff] %v394_v45  }
 0x2cc   :  { %v338_v46 = vsel %vm330_vm3, %v326_v24, %v334_v25 }
 0x2cd   :  { %v399_v47 = vpack.c.bf16 %v338_v46, %v337_v30 }
 0x2cf   :  { %401 = vst [vmem:[%s619_s4 + $0x8] sm:$0xff] %v399_v47  }

// kernel: discriminator_forward.7
= control target key start
LH: loop header
LB: loop body
LE: loop exit
PB: predicated region body
PF: predicated region fallthrough
CT: control target
= control target key end

     0   :  { %s1624_s1 = inlined_call_operand.vmem [shape: bf16[512,128], index: 1, kind: input, shape index: {}]   ;;  %s1625_s0 = inlined_call_operand.vmem [shape: bf16[64,512], index: 0, kind: input, shape index: {}]   ;;  %s1626_s5 = inlined_call_operand.vmem [shape: f32[128,128], index: 5, kind: input, shape index: {}]   ;;  %s1627_s2 = inlined_call_operand.vmem [shape: f32[64,1], index: 2, kind: input, shape index: {}]   ;;  %s1628_s3 = inlined_call_operand.vmem [shape: f32[64,1], index: 3, kind: input, shape index: {}]   ;;  %s1629_s4 = inlined_call_operand.vmem [shape: f32[64,128], index: 4, kind: input, shape index: {}]   ;;  %s1630_s6 = inlined_call_operand.vmem [shape: f32[8,128], index: 6, kind: output, shape index: {}]  }
   0x1   :  { %v1165_v0 = vld [vmem:[%s1624_s1 + $0x40] sm:$0xff]   ;;  %v1169_v4 = vld [vmem:[%s1624_s1 + $0x48] sm:$0xff]   ;;  %v1173_v8 = vld [vmem:[%s1624_s1 + $0x50] sm:$0xff]  }
   0x2   :  { %v1166_v1 = vld [vmem:[%s1624_s1 + $0xc0] sm:$0xff]   ;;  %966 = vmatprep.subr.bf16.mxu0 %v1165_v0  ;;  %v1170_v5 = vld [vmem:[%s1624_s1 + $0xc8] sm:$0xff]   ;;  %v1174_v9 = vld [vmem:[%s1624_s1 + $0xd0] sm:$0xff]  }
   0x3   :  { %v1167_v2 = vld [vmem:[%s1624_s1] sm:$0xff]   ;;  %1006 = vmatprep.subr.bf16.mxu1 %v1166_v1  ;;  %v1171_v6 = vld [vmem:[%s1624_s1 + $0x8] sm:$0xff]   ;;  %v1175_v10 = vld [vmem:[%s1624_s1 + $0x10] sm:$0xff]  }
   0x4   :  { %v1168_v3 = vld [vmem:[%s1624_s1 + $0x80] sm:$0xff]   ;;  %967 = vmatpush3.bf16.msra.mxu0 %v1167_v2  ;;  %v1172_v7 = vld [vmem:[%s1624_s1 + $0x88] sm:$0xff]   ;;  %v1176_v11 = vld [vmem:[%s1624_s1 + $0x90] sm:$0xff]  }
   0x5   :  { %1007 = vmatpush3.bf16.msra.mxu1 %v1168_v3  ;;  %968 = vmatprep.subr.bf16.mxu0 %v1169_v4  ;;  %v1177_v12 = vld [vmem:[%s1624_s1 + $0x58] sm:$0xff]   ;;  %v1181_v16 = vld [vmem:[%s1624_s1 + $0x60] sm:$0xff]   ;;  %v1185_v20 = vld [vmem:[%s1624_s1 + $0x68] sm:$0xff]  }
   0x6   :  { %1008 = vmatprep.subr.bf16.mxu1 %v1170_v5  ;;  %v1178_v13 = vld [vmem:[%s1624_s1 + $0xd8] sm:$0xff]   ;;  %v1182_v17 = vld [vmem:[%s1624_s1 + $0xe0] sm:$0xff]   ;;  %v1186_v21 = vld [vmem:[%s1624_s1 + $0xe8] sm:$0xff]  }
   0x7   :  { %v1179_v14 = vld [vmem:[%s1624_s1 + $0x18] sm:$0xff]   ;;  %v1183_v18 = vld [vmem:[%s1624_s1 + $0x20] sm:$0xff]   ;;  %v1187_v22 = vld [vmem:[%s1624_s1 + $0x28] sm:$0xff]  }
   0x8   :  { %969 = vmatpush3.bf16.msra.mxu0 %v1171_v6  ;;  %v1180_v15 = vld [vmem:[%s1624_s1 + $0x98] sm:$0xff]   ;;  %v1184_v19 = vld [vmem:[%s1624_s1 + $0xa0] sm:$0xff]   ;;  %v1188_v23 = vld [vmem:[%s1624_s1 + $0xa8] sm:$0xff]  }
   0x9   :  { %1009 = vmatpush3.bf16.msra.mxu1 %v1172_v7  ;;  %970 = vmatprep.subr.bf16.mxu0 %v1173_v8  ;;  %v1189_v24 = vld [vmem:[%s1624_s1 + $0x70] sm:$0xff]   ;;  %v1193_v28 = vld [vmem:[%s1624_s1 + $0x78] sm:$0xff]  }
   0xa   :  { %1010 = vmatprep.subr.bf16.mxu1 %v1174_v9  ;;  %v1190_v25 = vld [vmem:[%s1624_s1 + $0xf0] sm:$0xff]   ;;  %v1194_v29 = vld [vmem:[%s1624_s1 + $0xf8] sm:$0xff]  }
   0xb   :  { %v1191_v26 = vld [vmem:[%s1624_s1 + $0x30] sm:$0xff]   ;;  %v1195_v30 = vld [vmem:[%s1624_s1 + $0x38] sm:$0xff]  }
   0xc   :  { %971 = vmatpush3.bf16.msra.mxu0 %v1175_v10  ;;  %v1192_v27 = vld [vmem:[%s1624_s1 + $0xb0] sm:$0xff]   ;;  %v1196_v31 = vld [vmem:[%s1624_s1 + $0xb8] sm:$0xff]  }
   0xd   :  { %1011 = vmatpush3.bf16.msra.mxu1 %v1176_v11  ;;  %972 = vmatprep.subr.bf16.mxu0 %v1177_v12  ;;  %v1197_v32 = vld [vmem:[%s1625_s0] ss:$16 sps:$4 sm:$0xff]   ;;  %v1199_v33 = vld [vmem:[%s1625_s0 + $0x4] ss:$16 sps:$4 sm:$0xff]   ;;  %v1200_v34 = vld [vmem:[%s1625_s0 + $0x8] ss:$16 sps:$4 sm:$0xff]  }
   0xe   :  { %1012 = vmatprep.subr.bf16.mxu1 %v1178_v13  ;;  %v1202_v35 = vld [vmem:[%s1625_s0 + $0xc] ss:$16 sps:$4 sm:$0xff]   ;;  %408 = vmatprep.mubr.bf16.mxu0 %v1199_v33  ;;  %v1203_v36 = vld [vmem:[%s1625_s0 + $0x24] ss:$16 sps:$4 sm:$0xff]   ;;  %v1207_v38 = vld [vmem:[%s1625_s0 + $0x20] ss:$16 sps:$4 sm:$0xff]  }
   0xf   :  { %473 = vmatprep.mubr.bf16.mxu1 %v1202_v35  ;;  %v1205_v37 = vld [vmem:[%s1625_s0 + $0x2c] ss:$16 sps:$4 sm:$0xff]   ;;  %v1208_v39 = vld [vmem:[%s1625_s0 + $0x28] ss:$16 sps:$4 sm:$0xff]   ;;  %v1209_v40 = vld [vmem:[%s1625_s0 + $0x44] ss:$16 sps:$4 sm:$0xff]  }
  0x10   :  { %973 = vmatpush3.bf16.msra.mxu0 %v1179_v14  ;;  %v1211_v41 = vld [vmem:[%s1625_s0 + $0x4c] ss:$16 sps:$4 sm:$0xff]   ;;  %v1213_v42 = vld [vmem:[%s1625_s0 + $0x40] ss:$16 sps:$4 sm:$0xff]   ;;  %v1214_v43 = vld [vmem:[%s1625_s0 + $0x48] ss:$16 sps:$4 sm:$0xff]  }
  0x11   :  { %1013 = vmatpush3.bf16.msra.mxu1 %v1180_v15  ;;  %974 = vmatprep.subr.bf16.mxu0 %v1181_v16  ;;  %v1215_v44 = vld [vmem:[%s1625_s0 + $0x64] ss:$16 sps:$4 sm:$0xff]   ;;  %v1217_v45 = vld [vmem:[%s1625_s0 + $0x6c] ss:$16 sps:$4 sm:$0xff]   ;;  %v1219_v46 = vld [vmem:[%s1625_s0 + $0x60] ss:$16 sps:$4 sm:$0xff]  }
  0x12   :  { %1014 = vmatprep.subr.bf16.mxu1 %v1182_v17  ;;  %v1220_v47 = vld [vmem:[%s1625_s0 + $0x68] ss:$16 sps:$4 sm:$0xff]  }
  0x14   :  { %975 = vmatpush3.bf16.msra.mxu0 %v1183_v18 }
  0x15   :  { %1015 = vmatpush3.bf16.msra.mxu1 %v1184_v19  ;;  %976 = vmatprep.subr.bf16.mxu0 %v1185_v20 }
  0x16   :  { %1016 = vmatprep.subr.bf16.mxu1 %v1186_v21 }
  0x18   :  { %977 = vmatpush3.bf16.msra.mxu0 %v1187_v22 }
  0x19   :  { %1017 = vmatpush3.bf16.msra.mxu1 %v1188_v23  ;;  %978 = vmatprep.subr.bf16.mxu0 %v1189_v24 }
  0x1a   :  { %1018 = vmatprep.subr.bf16.mxu1 %v1190_v25 }
  0x1c   :  { %979 = vmatpush3.bf16.msra.mxu0 %v1191_v26 }
  0x1d   :  { %1019 = vmatpush3.bf16.msra.mxu1 %v1192_v27  ;;  %980 = vmatprep.subr.bf16.mxu0 %v1193_v28 }
  0x1e   :  { %1020 = vmatprep.subr.bf16.mxu1 %v1194_v29 }
  0x20   :  { %981 = vmatpush3.bf16.msra.mxu0 %v1195_v30 }
  0x21   :  { %1021 = vmatpush3.bf16.msra.mxu1 %v1196_v31 }
  0x23   :  { %409 = vmatmul.mubr.bf16.vlgmr.msra.gmra.mrb[0].mxu0 %v1197_v32 }
  0x24   :  { %474 = vmatmul.mubr.bf16.vlgmr.msra.gmra.mrb[0].mxu1 %v1200_v34  ;;  %416 = vmatprep.mubr.bf16.mxu0 %v1203_v36 }
  0x25   :  { %481 = vmatprep.mubr.bf16.mxu1 %v1205_v37 }
  0x2b   :  { %417 = vmatmul.mubr.bf16.gmra.mrb[4].mxu0 %v1207_v38 }
  0x2c   :  { %482 = vmatmul.mubr.bf16.gmra.mrb[4].mxu1 %v1208_v39  ;;  %424 = vmatprep.mubr.bf16.mxu0 %v1209_v40  ;;  %v554_v40 = vlaneseq }
  0x2d   :  { %489 = vmatprep.mubr.bf16.mxu1 %v1211_v41 }
  0x2e   :  { %v555_v41 = vand.u32 127, %v554_v40 }
  0x30   :  { %vm556_vm0 = vcmp.lt.s32.totalorder %v555_v41, 32 }
  0x33   :  { %425 = vmatmul.mubr.bf16.gmra.mrb[8].mxu0 %v1213_v42 }
  0x34   :  { %490 = vmatmul.mubr.bf16.gmra.mrb[8].mxu1 %v1214_v43  ;;  %432 = vmatprep.mubr.bf16.mxu0 %v1215_v44 }
  0x35   :  { %497 = vmatprep.mubr.bf16.mxu1 %v1217_v45 }
  0x3b   :  { %433 = vmatmul.mubr.bf16.gmra.mrb[12].mxu0 %v1219_v46 }
  0x3c   :  { %498 = vmatmul.mubr.bf16.gmra.mrb[12].mxu1 %v1220_v47 }
  0xf6   :  { %v982_v48 = vpop.f32.mrb[0].mxu0 }
  0xf7   :  { %v1022_v49 = vpop.f32.mrb[0].mxu1  ;;  %v983_v50 = vpop.f32.mrb[1].mxu0 }
  0xf8   :  { %v984_v51 = vadd.f32 %v983_v50, %v982_v48  ;;  %v1023_v52 = vpop.f32.mrb[1].mxu1  ;;  %v985_v53 = vpop.f32.mrb[2].mxu0 }
  0xf9   :  { %v1024_v54 = vadd.f32 %v1023_v52, %v1022_v49  ;;  %v1025_v55 = vpop.f32.mrb[2].mxu1  ;;  %v986_v56 = vpop.f32.mrb[3].mxu0 }
  0xfa   :  { %v987_v57 = vadd.f32 %v986_v56, %v985_v53  ;;  %v1026_v58 = vpop.f32.mrb[3].mxu1 }
  0xfb   :  { %v1421_v59 = vadd.f32 %v1024_v54, %v984_v51  ;;  %v1027_v60 = vadd.f32 %v1026_v58, %v1025_v55 }
  0xfd   :  { %v1423_v61 = vadd.f32 %v1027_v60, %v987_v57  ;;  %522 = vadd.xlane.f32.xlu0 %v1421_v59 }
  0xfe   :  { %v988_v62 = vpop.f32.mrb[4].mxu0 }
  0xff   :  { %v1028_v63 = vpop.f32.mrb[4].mxu1  ;;  %v989_v0 = vpop.f32.mrb[5].mxu0 }
 0x100   :  { %v990_v1 = vadd.f32 %v989_v0, %v988_v62  ;;  %v1029_v2 = vpop.f32.mrb[5].mxu1  ;;  %v991_v3 = vpop.f32.mrb[6].mxu0 }
 0x101   :  { %v1030_v4 = vadd.f32 %v1029_v2, %v1028_v63  ;;  %524 = vadd.xlane.f32.xlu0 %v1423_v61  ;;  %v1031_v5 = vpop.f32.mrb[6].mxu1  ;;  %v992_v6 = vpop.f32.mrb[7].mxu0 }
 0x102   :  { %v993_v7 = vadd.f32 %v992_v6, %v991_v3  ;;  %v1032_v8 = vpop.f32.mrb[7].mxu1 }
 0x103   :  { %v1427_v9 = vadd.f32 %v1030_v4, %v990_v1  ;;  %v1033_v10 = vadd.f32 %v1032_v8, %v1031_v5 }
 0x105   :  { %v1429_v11 = vadd.f32 %v1033_v10, %v993_v7  ;;  %526 = vadd.xlane.f32.xlu1 %v1427_v9 }
 0x106   :  { %v994_v12 = vpop.f32.mrb[8].mxu0 }
 0x107   :  { %v1034_v13 = vpop.f32.mrb[8].mxu1  ;;  %v995_v14 = vpop.f32.mrb[9].mxu0 }
 0x108   :  { %v996_v15 = vadd.f32 %v995_v14, %v994_v12  ;;  %v1035_v16 = vpop.f32.mrb[9].mxu1  ;;  %v997_v17 = vpop.f32.mrb[10].mxu0 }
 0x109   :  { %v1036_v18 = vadd.f32 %v1035_v16, %v1034_v13  ;;  %v1037_v19 = vpop.f32.mrb[10].mxu1  ;;  %528 = vadd.xlane.f32.xlu1 %v1429_v11  ;;  %v998_v20 = vpop.f32.mrb[11].mxu0 }
 0x10a   :  { %v999_v21 = vadd.f32 %v998_v20, %v997_v17  ;;  %v1038_v22 = vpop.f32.mrb[11].mxu1 }
 0x10b   :  { %v1433_v23 = vadd.f32 %v1036_v18, %v996_v15  ;;  %v1039_v24 = vadd.f32 %v1038_v22, %v1037_v19  ;;  %v1241_v22 = vmov 0  }
 0x10c   :  { %1163 = vset.pattern.permute.xlu0 %v1241_v22  ;;  %1164 = vset.pattern.permute.xlu1 %v1241_v22  ;;  %v785_v22 = vld [vmem:[%s1626_s5 + $0x60] sm:$0xff] }
 0x10d   :  { %v1435_v25 = vadd.f32 %v1039_v24, %v999_v21  ;;  %530 = vadd.xlane.f32.xlu0 %v1433_v23  ;;  %v773_v24 = vld [vmem:[%s1626_s5] sm:$0xff] }
 0x10e   :  { %v1000_v26 = vpop.f32.mrb[12].mxu0 }
 0x10f   :  { %v1040_v27 = vpop.f32.mrb[12].mxu1  ;;  %532 = vadd.xlane.f32.xlu1 %v1435_v25  ;;  %v1001_v28 = vpop.f32.mrb[13].mxu0 }
 0x110   :  { %v1002_v29 = vadd.f32 %v1001_v28, %v1000_v26  ;;  %v1041_v30 = vpop.f32.mrb[13].mxu1  ;;  %v1003_v31 = vpop.f32.mrb[14].mxu0  ;;  %v774_v26 = vld [vmem:[%s1626_s5 + $0x8] sm:$0xff] }
 0x111   :  { %v1042_v32 = vadd.f32 %v1041_v30, %v1040_v27  ;;  %v1043_v33 = vpop.f32.mrb[14].mxu1  ;;  %v1004_v34 = vpop.f32.mrb[15].mxu0  ;;  %v775_v27 = vld [vmem:[%s1626_s5 + $0x10] sm:$0xff]  ;;  %v1114_v28 = vpack.c.bf16 %v774_v26, %v773_v24  ;;  %v786_v24 = vld [vmem:[%s1626_s5 + $0x68] sm:$0xff] }
 0x112   :  { %v1005_v35 = vadd.f32 %v1004_v34, %v1003_v31  ;;  %v1044_v36 = vpop.f32.mrb[15].mxu1  ;;  %v777_v31 = vld [vmem:[%s1626_s5 + $0x20] sm:$0xff]  ;;  %v779_v34 = vld [vmem:[%s1626_s5 + $0x30] sm:$0xff] }
 0x113   :  { %v1439_v37 = vadd.f32 %v1042_v32, %v1002_v29  ;;  %v1045_v38 = vadd.f32 %v1044_v36, %v1043_v33  ;;  %v776_v29 = vld [vmem:[%s1626_s5 + $0x18] sm:$0xff]  ;;  %v778_v32 = vld [vmem:[%s1626_s5 + $0x28] sm:$0xff]  ;;  %1115 = vmatprep.subr.bf16.mxu0 %v1114_v28  ;;  %1146 = vmatprep.subr.bf16.mxu1 %v1114_v28 }
 0x114   :  { %v1118_v30 = vpack.c.bf16 %v776_v29, %v775_v27  ;;  %1117 = vmatpush3.bf16.msra.mxu0 %v1114_v28  ;;  %1154 = vmatpush3.bf16.msra.mxu1 %v1114_v28  ;;  %v1122_v33 = vpack.c.bf16 %v778_v32, %v777_v31  ;;  %v508_v31 = vld [vmem:[%s1627_s2 + $0x10] sm:$0xff] }
 0x115   :  { %v1441_v39 = vadd.f32 %v1045_v38, %v1005_v35  ;;  %534 = vadd.xlane.f32.xlu0 %v1439_v37  ;;  %v780_v35 = vld [vmem:[%s1626_s5 + $0x38] sm:$0xff]  ;;  %v787_v32 = vld [vmem:[%s1626_s5 + $0x70] sm:$0xff] }
 0x116   :  { %1119 = vmatprep.subr.bf16.mxu0 %v1118_v30  ;;  %1147 = vmatprep.subr.bf16.mxu1 %v1118_v30  ;;  %v1126_v36 = vpack.c.bf16 %v780_v35, %v779_v34  ;;  %v511_v35 = vld [vmem:[%s1627_s2 + $0x28] sm:$0xff] }
 0x117   :  { %536 = vadd.xlane.f32.xlu1 %v1441_v39 }
 0x118   :  { %1121 = vmatpush3.bf16.msra.mxu0 %v1118_v30  ;;  %1155 = vmatpush3.bf16.msra.mxu1 %v1118_v30 }
 0x119   :  { %1123 = vmatprep.subr.bf16.mxu0 %v1122_v33  ;;  %1148 = vmatprep.subr.bf16.mxu1 %v1122_v33 }
 0x11c   :  { %1125 = vmatpush3.bf16.msra.mxu0 %v1122_v33  ;;  %1156 = vmatpush3.bf16.msra.mxu1 %v1122_v33  ;;  %v788_v33 = vld [vmem:[%s1626_s5 + $0x78] sm:$0xff] }
 0x11d   :  { %1127 = vmatprep.subr.bf16.mxu0 %v1126_v36  ;;  %1149 = vmatprep.subr.bf16.mxu1 %v1126_v36 }
 0x120   :  { %1129 = vmatpush3.bf16.msra.mxu0 %v1126_v36  ;;  %1157 = vmatpush3.bf16.msra.mxu1 %v1126_v36  ;;  %v1142_v36 = vpack.c.bf16 %v788_v33, %v787_v32 }
 0x18a   :  { %v523_v42 = vpop.xlane.xlu0 %522 }
 0x18b   :  { %v1445_v43 = vmul.f32 0.03125, %v523_v42 }
 0x18d   :  { %v546_v44 = vsub.f32 %v1421_v59, %v1445_v43 }
 0x18e   :  { %v525_v45 = vpop.xlane.xlu0 %524 }
 0x18f   :  { %v1449_v46 = vmul.f32 0.03125, %v525_v45  ;;  %v557_v47 = vsel %vm556_vm0, %v546_v44, 0.0 }
 0x190   :  { %v565_v48 = vmul.f32 %v557_v47, %v557_v47 }
 0x191   :  { %v547_v49 = vsub.f32 %v1423_v61, %v1449_v46 }
 0x192   :  { %v527_v50 = vpop.xlane.xlu1 %526  ;;  %573 = vadd.xlane.f32.xlu0 %v565_v48 }
 0x193   :  { %v1454_v51 = vmul.f32 0.03125, %v527_v50  ;;  %v558_v52 = vsel %vm556_vm0, %v547_v49, 0.0  ;;  %v506_v50 = vld [vmem:[%s1627_s2] sm:$0xff] }
 0x194   :  { %v566_v53 = vmul.f32 %v558_v52, %v558_v52 }
 0x195   :  { %v548_v54 = vsub.f32 %v1427_v9, %v1454_v51 }
 0x196   :  { %v529_v55 = vpop.xlane.xlu1 %528  ;;  %575 = vadd.xlane.f32.xlu1 %v566_v53 }
 0x197   :  { %v1459_v56 = vmul.f32 0.03125, %v529_v55  ;;  %v559_v57 = vsel %vm556_vm0, %v548_v54, 0.0 }
 0x198   :  { %v567_v58 = vmul.f32 %v559_v57, %v559_v57  ;;  %v507_v57 = vld [vmem:[%s1627_s2 + $0x8] sm:$0xff] }
 0x199   :  { %v549_v60 = vsub.f32 %v1429_v11, %v1459_v56 }
 0x19a   :  { %577 = vadd.xlane.f32.xlu0 %v567_v58  ;;  %v531_v62 = vpop.xlane.xlu0 %530 }
 0x19b   :  { %v1464_v63 = vmul.f32 0.03125, %v531_v62  ;;  %v560_v0 = vsel %vm556_vm0, %v549_v60, 0.0  ;;  %v781_v62 = vld [vmem:[%s1626_s5 + $0x40] sm:$0xff] }
 0x19c   :  { %v533_v1 = vpop.xlane.xlu1 %532  ;;  %v568_v2 = vmul.f32 %v560_v0, %v560_v0  ;;  %v782_v0 = vld [vmem:[%s1626_s5 + $0x48] sm:$0xff] }
 0x19d   :  { %v550_v3 = vsub.f32 %v1433_v23, %v1464_v63  ;;  %v1469_v4 = vmul.f32 0.03125, %v533_v1 }
 0x19e   :  { %579 = vadd.xlane.f32.xlu1 %v568_v2 }
 0x19f   :  { %v551_v5 = vsub.f32 %v1435_v25, %v1469_v4  ;;  %v561_v6 = vsel %vm556_vm0, %v550_v3, 0.0 }
 0x1a0   :  { %v569_v7 = vmul.f32 %v561_v6, %v561_v6 }
 0x1a1   :  { %v562_v8 = vsel %vm556_vm0, %v551_v5, 0.0  ;;  %v1130_v5 = vpack.c.bf16 %v782_v0, %v781_v62  ;;  %v521_v0 = vld [vmem:[%s1628_s3 + $0x38] sm:$0xff] }
 0x1a2   :  { %581 = vadd.xlane.f32.xlu0 %v569_v7  ;;  %v535_v10 = vpop.xlane.xlu0 %534  ;;  %v570_v12 = vmul.f32 %v562_v8, %v562_v8 }
 0x1a3   :  { %v1475_v13 = vmul.f32 0.03125, %v535_v10  ;;  %v514_v10 = vld [vmem:[%s1628_s3] sm:$0xff]  ;;  %1131 = vmatprep.subr.bf16.mxu0 %v1130_v5  ;;  %1150 = vmatprep.subr.bf16.mxu1 %v1130_v5 }
 0x1a4   :  { %v537_v14 = vpop.xlane.xlu1 %536  ;;  %583 = vadd.xlane.f32.xlu1 %v570_v12  ;;  %1133 = vmatpush3.bf16.msra.mxu0 %v1130_v5 }
 0x1a5   :  { %v552_v15 = vsub.f32 %v1439_v37, %v1475_v13  ;;  %v1479_v16 = vmul.f32 0.03125, %v537_v14  ;;  %v783_v14 = vld [vmem:[%s1626_s5 + $0x50] sm:$0xff]  ;;  %1158 = vmatpush3.bf16.msra.mxu1 %v1130_v5 }
 0x1a7   :  { %v553_v17 = vsub.f32 %v1441_v39, %v1479_v16  ;;  %v563_v18 = vsel %vm556_vm0, %v552_v15, 0.0  ;;  %v784_v15 = vld [vmem:[%s1626_s5 + $0x58] sm:$0xff] }
 0x1a8   :  { %v571_v19 = vmul.f32 %v563_v18, %v563_v18 }
 0x1a9   :  { %v564_v20 = vsel %vm556_vm0, %v553_v17, 0.0 }
 0x1aa   :  { %585 = vadd.xlane.f32.xlu0 %v571_v19  ;;  %v572_v21 = vmul.f32 %v564_v20, %v564_v20  ;;  %v515_v19 = vld [vmem:[%s1628_s3 + $0x8] sm:$0xff] }
 0x1ac   :  { %587 = vadd.xlane.f32.xlu1 %v572_v21 }
 0x21f   :  { %v574_v38 = vpop.xlane.xlu0 %573 }
 0x220   :  { %v589_v40 = vmul.f32 0.03125, %v574_v38 }
 0x222   :  { %v597_v41 = vadd.f32 1e-05, %v589_v40 }
 0x223   :  { %v576_v42 = vpop.xlane.xlu1 %575 }
 0x224   :  { %1221 = vrsqrt.f32 %v597_v41  ;;  %v590_v44 = vmul.f32 0.03125, %v576_v42  ;;  %v509_v42 = vld [vmem:[%s1627_s2 + $0x18] sm:$0xff] }
 0x226   :  { %v598_v45 = vadd.f32 1e-05, %v590_v44 }
 0x227   :  { %v578_v47 = vpop.xlane.xlu0 %577 }
 0x228   :  { %1223 = vrsqrt.f32 %v598_v45  ;;  %v591_v48 = vmul.f32 0.03125, %v578_v47  ;;  %v519_v47 = vld [vmem:[%s1628_s3 + $0x28] sm:$0xff] }
 0x22a   :  { %v599_v54 = vadd.f32 1e-05, %v591_v48 }
 0x22b   :  { %v580_v49 = vpop.xlane.xlu1 %579 }
 0x22c   :  { %v592_v52 = vmul.f32 0.03125, %v580_v49  ;;  %1225 = vrsqrt.f32 %v599_v54  ;;  %v513_v54 = vld [vmem:[%s1627_s2 + $0x38] sm:$0xff] }
 0x22e   :  { %v1222_v53 = vpop.eup %1221  ;;  %v600_v58 = vadd.f32 1e-05, %v592_v52  ;;  %v516_v52 = vld [vmem:[%s1628_s3 + $0x10] sm:$0xff] }
 0x22f   :  { %v613_v55 = vmul.f32 %v1222_v53, %v506_v50  ;;  %v582_v2 = vpop.xlane.xlu0 %581 }
 0x230   :  { %1227 = vrsqrt.f32 %v600_v58  ;;  %v593_v12 = vmul.f32 0.03125, %v582_v2 }
 0x231   :  { %v584_v60 = vpop.xlane.xlu1 %583  ;;  %639 = vperm.xlu0 %1163, %v613_v55   ;;  %v621_v7 = vmul.f32 %v613_v55, %v1445_v43  ;;  %v1134_v43 = vpack.c.bf16 %v784_v15, %v783_v14  ;;  %v520_v14 = vld [vmem:[%s1628_s3 + $0x30] sm:$0xff] }
 0x232   :  { %v1224_v1 = vpop.eup %1223  ;;  %v594_v3 = vmul.f32 0.03125, %v584_v60  ;;  %v601_v20 = vadd.f32 1e-05, %v593_v12 }
 0x233   :  { %v614_v6 = vmul.f32 %v1224_v1, %v507_v57  ;;  %v629_v17 = vsub.f32 %v514_v10, %v621_v7  ;;  %1135 = vmatprep.subr.bf16.mxu0 %v1134_v43  ;;  %1151 = vmatprep.subr.bf16.mxu1 %v1134_v43  ;;  %v518_v7 = vld [vmem:[%s1628_s3 + $0x20] sm:$0xff] }
 0x234   :  { %v602_v8 = vadd.f32 1e-05, %v594_v3  ;;  %1137 = vmatpush3.bf16.msra.mxu0 %v1134_v43  ;;  %1159 = vmatpush3.bf16.msra.mxu1 %v1134_v43 }
 0x235   :  { %644 = vperm.xlu1 %1164, %v614_v6   ;;  %v622_v18 = vmul.f32 %v614_v6, %v1449_v46  ;;  %v1138_v46 = vpack.c.bf16 %v786_v24, %v785_v22 }
 0x236   :  { %1229 = vrsqrt.f32 %v602_v8  ;;  %v1226_v29 = vpop.eup %1225  ;;  %v512_v8 = vld [vmem:[%s1627_s2 + $0x30] sm:$0xff] }
 0x237   :  { %v586_v27 = vpop.xlane.xlu0 %585  ;;  %v630_v28 = vsub.f32 %v515_v19, %v622_v18  ;;  %1139 = vmatprep.subr.bf16.mxu0 %v1138_v46  ;;  %1152 = vmatprep.subr.bf16.mxu1 %v1138_v46  ;;  %1231 = vrsqrt.f32 %v601_v20  ;;  %v615_v40 = vmul.f32 %v1226_v29, %v508_v31 }
 0x238   :  { %1141 = vmatpush3.bf16.msra.mxu0 %v1138_v46  ;;  %v595_v34 = vmul.f32 0.03125, %v586_v27  ;;  %1160 = vmatpush3.bf16.msra.mxu1 %v1138_v46  ;;  %v758_v27 = vld [vmem:[%s1629_s4 + $0x8] sm:$0xff] }
 0x239   :  { %v588_v21 = vpop.xlane.xlu1 %587  ;;  %687 = vperm.xlu1 %1164, %v629_v17   ;;  %1143 = vmatprep.subr.bf16.mxu0 %v1142_v36  ;;  %v623_v50 = vmul.f32 %v615_v40, %v1454_v51  ;;  %v517_v51 = vld [vmem:[%s1628_s3 + $0x18] sm:$0xff] }
 0x23a   :  { %v596_v26 = vmul.f32 0.03125, %v588_v21  ;;  %v1228_v38 = vpop.eup %1227  ;;  %1153 = vmatprep.subr.bf16.mxu1 %v1142_v36  ;;  %v603_v45 = vadd.f32 1e-05, %v595_v34 }
 0x23b   :  { %v616_v48 = vmul.f32 %v1228_v38, %v509_v42  ;;  %v631_v57 = vsub.f32 %v516_v52, %v623_v50 }
 0x23c   :  { %v604_v30 = vadd.f32 1e-05, %v596_v26  ;;  %1145 = vmatpush3.bf16.msra.mxu0 %v1142_v36  ;;  %1161 = vmatpush3.bf16.msra.mxu1 %v1142_v36 }
 0x23d   :  { %692 = vperm.xlu1 %1164, %v630_v28   ;;  %v624_v58 = vmul.f32 %v616_v48, %v1459_v56 }
 0x23e   :  { %1233 = vrsqrt.f32 %v604_v30 }
 0x23f   :  { %1235 = vrsqrt.f32 %v603_v45  ;;  %v632_v1 = vsub.f32 %v517_v51, %v624_v58 }
 0x240   :  { %v1230_v41 = vpop.eup %1229 }
 0x241   :  { %649 = vperm.xlu1 %1164, %v615_v40   ;;  %v618_v44 = vmul.f32 %v1230_v41, %v511_v35  ;;  %v1232_v55 = vpop.eup %1231  ;;  %v759_v40 = vld [vmem:[%s1629_s4 + $0x10] sm:$0xff] }
 0x243   :  { %664 = vperm.xlu0 %1163, %v618_v44   ;;  %v626_v49 = vmul.f32 %v618_v44, %v1469_v4  ;;  %v510_v4 = vld [vmem:[%s1627_s2 + $0x20] sm:$0xff] }
 0x244   :  { %v617_v56 = vmul.f32 %v1232_v55, %v510_v4  ;;  %v761_v4 = vld [vmem:[%s1629_s4 + $0x20] sm:$0xff] }
 0x245   :  { %654 = vperm.xlu1 %1164, %v616_v48   ;;  %v634_v53 = vsub.f32 %v519_v47, %v626_v49  ;;  %v760_v49 = vld [vmem:[%s1629_s4 + $0x18] sm:$0xff] }
 0x246   :  { %v625_v5 = vmul.f32 %v617_v56, %v1464_v63 }
 0x247   :  { %712 = vperm.xlu0 %1163, %v634_v53  }
 0x248   :  { %v1234_v60 = vpop.eup %1233  ;;  %v633_v10 = vsub.f32 %v518_v7, %v625_v5 }
 0x249   :  { %697 = vperm.xlu1 %1164, %v631_v57   ;;  %v620_v62 = vmul.f32 %v1234_v60, %v513_v54  ;;  %v1236_v6 = vpop.eup %1235 }
 0x24a   :  { %v619_v12 = vmul.f32 %v1236_v6, %v512_v8 }
 0x24b   :  { %674 = vperm.xlu0 %1163, %v620_v62   ;;  %v628_v2 = vmul.f32 %v620_v62, %v1479_v16  ;;  %v762_v62 = vld [vmem:[%s1629_s4 + $0x28] sm:$0xff] }
 0x24c   :  { %v627_v16 = vmul.f32 %v619_v12, %v1475_v13  ;;  %v757_v13 = vld [vmem:[%s1629_s4] sm:$0xff] }
 0x24d   :  { %702 = vperm.xlu1 %1164, %v632_v1   ;;  %v636_v3 = vsub.f32 %v521_v0, %v628_v2 }
 0x24e   :  { %v635_v63 = vsub.f32 %v520_v14, %v627_v16  ;;  %v764_v16 = vld [vmem:[%s1629_s4 + $0x38] sm:$0xff] }
 0x24f   :  { %722 = vperm.xlu0 %1163, %v636_v3  }
 0x251   :  { %659 = vperm.xlu1 %1164, %v617_v56  }
 0x255   :  { %707 = vperm.xlu1 %1164, %v633_v10   ;;  %v763_v10 = vld [vmem:[%s1629_s4 + $0x30] sm:$0xff] }
 0x259   :  { %669 = vperm.xlu1 %1164, %v619_v12  }
 0x25d   :  { %717 = vperm.xlu1 %1164, %v635_v63  }
 0x2b0   :  { %v640_v15 = vpop.permute.xlu0 %639 }
 0x2b1   :  { %v677_v17 = vmul.f32 %v640_v15, %v1421_v59 }
 0x2b4   :  { %v645_v43 = vpop.permute.xlu1 %644 }
 0x2b5   :  { %v678_v20 = vmul.f32 %v645_v43, %v1423_v61 }
 0x2b8   :  { %v688_v18 = vpop.permute.xlu1 %687 }
 0x2b9   :  { %v725_v19 = vadd.f32 %v688_v18, %v677_v17 }
 0x2bb   :  { %vm733_vm1 = vcmp.ge.f32.partialorder %v725_v19, 0.0  ;;  %v741_v21 = vmul.f32 0.2, %v725_v19 }
 0x2bc   :  { %v693_v22 = vpop.permute.xlu1 %692 }
 0x2bd   :  { %v726_v24 = vadd.f32 %v693_v22, %v678_v20  ;;  %v749_v26 = vsel %vm733_vm1, %v725_v19, %v741_v21 }
 0x2be   :  { %v765_v46 = vmul.f32 %v757_v13, %v749_v26 }
 0x2bf   :  { %vm734_vm2 = vcmp.ge.f32.partialorder %v726_v24, 0.0  ;;  %v742_v59 = vmul.f32 0.2, %v726_v24 }
 0x2c0   :  { %v650_v28 = vpop.permute.xlu1 %649  ;;  %1102 = vmatprep.mubr.f32.mxu0 %v765_v46 }
 0x2c1   :  { %v750_v29 = vsel %vm734_vm2, %v726_v24, %v742_v59  ;;  %v679_v32 = vmul.f32 %v650_v28, %v1427_v9 }
 0x2c2   :  { %v766_v61 = vmul.f32 %v758_v27, %v750_v29  ;;  %v665_v30 = vpop.permute.xlu0 %664 }
 0x2c3   :  { %v682_v45 = vmul.f32 %v665_v30, %v1435_v25 }
 0x2c4   :  { %v655_v31 = vpop.permute.xlu1 %654  ;;  %1103 = vmatmul.mubr.f32.vlgmr.msra.gmra.mrb[16].mxu0 %v766_v61 }
 0x2c5   :  { %v680_v36 = vmul.f32 %v655_v31, %v1429_v11 }
 0x2c6   :  { %v713_v34 = vpop.permute.xlu0 %712 }
 0x2c7   :  { %v730_v11 = vadd.f32 %v713_v34, %v682_v45 }
 0x2c8   :  { %v698_v33 = vpop.permute.xlu1 %697 }
 0x2c9   :  { %v727_v35 = vadd.f32 %v698_v33, %v679_v32  ;;  %v746_v55 = vmul.f32 0.2, %v730_v11  ;;  %vm738_vm5 = vcmp.ge.f32.partialorder %v730_v11, 0.0 }
 0x2ca   :  { %v675_v48 = vpop.permute.xlu0 %674 }
 0x2cb   :  { %vm735_vm3 = vcmp.ge.f32.partialorder %v727_v35, 0.0  ;;  %v743_v38 = vmul.f32 0.2, %v727_v35  ;;  %v684_v60 = vmul.f32 %v675_v48, %v1441_v39  ;;  %v754_v0 = vsel %vm738_vm5, %v730_v11, %v746_v55 }
 0x2cc   :  { %v703_v41 = vpop.permute.xlu1 %702  ;;  %v770_v3 = vmul.f32 %v762_v62, %v754_v0 }
 0x2cd   :  { %v728_v42 = vadd.f32 %v703_v41, %v680_v36  ;;  %v751_v44 = vsel %vm735_vm3, %v727_v35, %v743_v38 }
 0x2ce   :  { %v767_v47 = vmul.f32 %v759_v40, %v751_v44  ;;  %v723_v25 = vpop.permute.xlu0 %722 }
 0x2cf   :  { %vm736_vm4 = vcmp.ge.f32.partialorder %v728_v42, 0.0  ;;  %v744_v9 = vmul.f32 0.2, %v728_v42 }
 0x2d0   :  { %v660_v50 = vpop.permute.xlu1 %659  ;;  %1105 = vmatprep.mubr.f32.mxu0 %v767_v47 }
 0x2d1   :  { %v752_v52 = vsel %vm736_vm4, %v728_v42, %v744_v9  ;;  %v681_v54 = vmul.f32 %v660_v50, %v1433_v23  ;;  %v732_v23 = vadd.f32 %v723_v25, %v684_v60 }
 0x2d2   :  { %v768_v53 = vmul.f32 %v760_v49, %v752_v52 }
 0x2d3   :  { %v748_v6 = vmul.f32 0.2, %v732_v23  ;;  %vm740_vm7 = vcmp.ge.f32.partialorder %v732_v23, 0.0 }
 0x2d4   :  { %v708_v57 = vpop.permute.xlu1 %707  ;;  %1106 = vmatmul.mubr.f32.gmra.mrb[18].mxu0 %v768_v53 }
 0x2d5   :  { %v729_v58 = vadd.f32 %v708_v57, %v681_v54  ;;  %v756_v12 = vsel %vm740_vm7, %v732_v23, %v748_v6 }
 0x2d7   :  { %vm737_vm6 = vcmp.ge.f32.partialorder %v729_v58, 0.0  ;;  %v745_v51 = vmul.f32 0.2, %v729_v58 }
 0x2d8   :  { %v670_v1 = vpop.permute.xlu1 %669 }
 0x2d9   :  { %v753_v2 = vsel %vm737_vm6, %v729_v58, %v745_v51  ;;  %v683_v5 = vmul.f32 %v670_v1, %v1439_v37  ;;  %v772_v37 = vmul.f32 %v764_v16, %v756_v12 }
 0x2da   :  { %v769_v56 = vmul.f32 %v761_v4, %v753_v2 }
 0x2dc   :  { %1108 = vmatprep.mubr.f32.mxu1 %v769_v56  ;;  %v718_v39 = vpop.permute.xlu1 %717 }
 0x2dd   :  { %v731_v7 = vadd.f32 %v718_v39, %v683_v5  ;;  %1109 = vmatmul.mubr.f32.vlgmr.msra.gmra.mrb[16].mxu1 %v770_v3 }
 0x2df   :  { %vm739_vm8 = vcmp.ge.f32.partialorder %v731_v7, 0.0  ;;  %v747_v8 = vmul.f32 0.2, %v731_v7 }
 0x2e1   :  { %v755_v14 = vsel %vm739_vm8, %v731_v7, %v747_v8 }
 0x2e2   :  { %v771_v63 = vmul.f32 %v763_v10, %v755_v14 }
 0x2e4   :  { %1111 = vmatprep.mubr.f32.mxu1 %v771_v63 }
 0x2e5   :  { %1112 = vmatmul.mubr.f32.gmra.mrb[18].mxu1 %v772_v37 }
 0x397   :  { %v1104_v15 = vpop.f32.mrb[16].mxu0 }
 0x398   :  { %v855_v43 = vpop.f32.mrb[17].mxu0 }
 0x399   :  { %v894_v17 = vadd.f32 %v1104_v15, %v855_v43 }
 0x3a7   :  { %v1107_v18 = vpop.f32.mrb[18].mxu0 }
 0x3a8   :  { %v865_v19 = vpop.f32.mrb[19].mxu0 }
 0x3a9   :  { %v895_v20 = vadd.f32 %v894_v17, %v865_v19 }
 0x3ab   :  { %v896_v21 = vadd.f32 %v1107_v18, %v895_v20 }
 0x3b0   :  { %v1110_v13 = vpop.f32.mrb[16].mxu1 }
 0x3b1   :  { %v875_v22 = vpop.f32.mrb[17].mxu1 }
 0x3b2   :  { %v897_v24 = vadd.f32 %v896_v21, %v875_v22 }
 0x3b4   :  { %v898_v26 = vadd.f32 %v1110_v13, %v897_v24 }
 0x3b8   :  { %v1113_v46 = vpop.f32.mrb[18].mxu1 }
 0x3b9   :  { %v885_v27 = vpop.f32.mrb[19].mxu1 }
 0x3ba   :  { %v899_v59 = vadd.f32 %v898_v26, %v885_v27 }
 0x3bc   :  { %v900_v28 = vadd.f32 %v1113_v46, %v899_v59 }
 0x3be   :  { %v901_v29 = vrot.slane %v900_v28, 4 }
 0x3c0   :  { %v902_v61 = vadd.f32 %v901_v29, %v900_v28 }
 0x3c2   :  { %v903_v30 = vrot.slane %v902_v61, 2 }
 0x3c4   :  { %v904_v31 = vadd.f32 %v903_v30, %v902_v61 }
 0x3c6   :  { %v905_v32 = vrot.slane %v904_v31, 1 }
 0x3c8   :  { %v906_v33 = vadd.f32 %v905_v32, %v904_v31 }
 0x3ca   :  { %v907_v34 = vsub.f32 0.0, %v906_v33 }
 0x3cc   :  { %v908_v35 = vmul.f32 1.442695, %v907_v34 }
 0x3ce   :  { %1237 = vpow2.f32 %v908_v35 }
 0x3d8   :  { %v1238_v36 = vpop.eup %1237 }
 0x3d9   :  { %v910_v38 = vadd.f32 1.0, %v1238_v36 }
 0x3db   :  { %1239 = vrcp.f32 %v910_v38 }
 0x3e5   :  { %v1240_v40 = vpop.eup %1239 }
 0x3e6   :  { %913 = vst [vmem:[%s1630_s6] sm:$0xff] %v1240_v40 }

</bundles_post_ra>
